<compile_context>
chip_gen: v7x
topology: tpu7x:2x2x1
jax: 0.10.0
libtpu: 0.0.40
codegen_flags: <defaults>
</compile_context>

<pallas_src>
import functools

import numpy as np

import jax
import jax.numpy as jnp
from jax.experimental import pallas as pl
from jax.experimental.pallas import tpu as pltpu


VMEM_SPEC = pl.BlockSpec(memory_space=pltpu.MemorySpace.VMEM)


# ------------------------------ fused kernel -------------------------------- #

def _sub_encoder_kernel(x_ref, wqkv_ref, bqkv_ref, mask_ref,
                        fcw_ref, fcb_ref, w1_ref, b1_ref, w2_ref, b2_ref,
                        o_ref, *, seq, batch, hidden, heads, scale):
    S, B, H = seq, batch, hidden
    Sq = S // heads

    x = x_ref[...]                                            # (S*B, H), row = s*B + b

    # ---- fused QKV projection: one MXU matmul, x read from VMEM once ----
    qkv = jnp.dot(x, wqkv_ref[...], preferred_element_type=jnp.float32) + bqkv_ref[...]

    # ---- the module's "buggy" head reshape, done in-register (no HBM transpose) ----
    # (S*B, 3H) -> (S, B, 3H) -> batch-first (B, S, 3H).  Row s = i*heads + h of batch b
    # is exactly head h / position i of the reference's (B, heads, Sq, H) layout.
    qkv_bf = jnp.transpose(qkv.reshape(S, B, 3 * H), (1, 0, 2))
    q = qkv_bf[:, :, :H]
    k = qkv_bf[:, :, H:2 * H]
    v = qkv_bf[:, :, 2 * H:]

    # ---- attention: all heads flattened into ONE (S, S) score matrix per batch ----
    e = jnp.einsum("bsd,btd->bst", q, k, preferred_element_type=jnp.float32) * scale
    mv = mask_ref[...]                    # 0 keep / -1e10 src-masked / -1e30 cross-head
    e = jnp.where(mv < 0.0, mv, e)        # exact masked_fill; cross-head entries vanish
    e = e - jnp.max(e, axis=-1, keepdims=True)
    p = jnp.exp(e)
    p = p / jnp.sum(p, axis=-1, keepdims=True)                # exact softmax normalize
    att = jnp.einsum("bst,btd->bsd", p, v, preferred_element_type=jnp.float32)  # (B,S,H)

    # ---- inverse of the buggy reshape: (B,S,H) -> (Sq,B,heads,H) -> (S*B, H) ----
    v_att = jnp.transpose(att.reshape(B, Sq, heads, H), (1, 0, 2, 3)).reshape(S * B, H)

    # ---- fc -> +x -> whole-tensor LN -> ff1+ReLU -> ff2 -> +middle -> whole-tensor LN
    t = jnp.dot(v_att, fcw_ref[...], preferred_element_type=jnp.float32) + fcb_ref[...] + x
    mu = jnp.mean(t)
    var = jnp.mean(jnp.square(t - mu))
    middle = (t - mu) * jax.lax.rsqrt(var + 1e-5)

    h = jnp.dot(middle, w1_ref[...], preferred_element_type=jnp.float32) + b1_ref[...]
    h = jnp.maximum(h, 0.0)
    ff = jnp.dot(h, w2_ref[...], preferred_element_type=jnp.float32) + b2_ref[...]

    t2 = middle + ff
    mu2 = jnp.mean(t2)
    var2 = jnp.mean(jnp.square(t2 - mu2))
    o_ref[...] = (t2 - mu2) * jax.lax.rsqrt(var2 + 1e-5)


# --------------------------- SubEncoder forward ------------------------------ #

def sub_encoder_forward(kp, x, mask_val, heads=8):
    S, B, H = x.shape
    head_dim = H // heads
    assert heads * head_dim == H, "feature dimension is not divisible by heads"
    assert S % heads == 0, "the module's view(B, -1, heads, H) needs S divisible by heads"
    assert mask_val.shape == (B, S, S)

    x2d = x.reshape(S * B, H)                                 # free (contiguous)

    out2d = pl.pallas_call(
        functools.partial(_sub_encoder_kernel, seq=S, batch=B, hidden=H, heads=heads,
                          scale=1.0 / float(np.sqrt(head_dim))),
        out_shape=jax.ShapeDtypeStruct((S * B, H), jnp.float32),
        in_specs=[VMEM_SPEC] * 10,
        out_specs=VMEM_SPEC,
    )(x2d, kp["wqkv_t"], kp["bqkv"], mask_val,
      kp["fc_w_t"], kp["fc_b"], kp["ff1_w_t"], kp["ff1_b"], kp["ff2_w_t"], kp["ff2_b"])

    return out2d.reshape(S, B, H)


# ------------------------------ param prep ----------------------------------- #

def init_params(key, hidden, ff_hidden):
    """PyTorch-layout parameters: Linear weights are (out, in), biases (out,)."""
    keys = jax.random.split(key, 12)

    def lin_init(kw, kb, out_dim, in_dim):
        w = jax.random.normal(kw, (out_dim, in_dim), jnp.float32) * 0.05
        b = jax.random.normal(kb, (out_dim,), jnp.float32) * 0.05
        return w, b

    p = {}
    p["wq_w"], p["wq_b"] = lin_init(keys[0], keys[1], hidden, hidden)
    p["wk_w"], p["wk_b"] = lin_init(keys[2], keys[3], hidden, hidden)
    p["wv_w"], p["wv_b"] = lin_init(keys[4], keys[5], hidden, hidden)
    p["fc_w"], p["fc_b"] = lin_init(keys[6], keys[7], hidden, hidden)
    p["ff1_w"], p["ff1_b"] = lin_init(keys[8], keys[9], ff_hidden, hidden)
    p["ff2_w"], p["ff2_b"] = lin_init(keys[10], keys[11], hidden, ff_hidden)
    return p


def prepare_params(p):
    """One-time (outside jit) layout prep: fuse QKV, transpose weights to (in, out),
    reshape biases to (1, out) -- no per-forward w.T / reshape HBM copies."""
    wqkv = jnp.concatenate([p["wq_w"], p["wk_w"], p["wv_w"]], axis=0)   # (3H, H)
    bqkv = jnp.concatenate([p["wq_b"], p["wk_b"], p["wv_b"]], axis=0)   # (3H,)
    return {
        "wqkv_t": jnp.transpose(wqkv),            # (H, 3H)
        "bqkv": bqkv.reshape(1, -1),              # (1, 3H)
        "fc_w_t": jnp.transpose(p["fc_w"]), "fc_b": p["fc_b"].reshape(1, -1),
        "ff1_w_t": jnp.transpose(p["ff1_w"]), "ff1_b": p["ff1_b"].reshape(1, -1),
        "ff2_w_t": jnp.transpose(p["ff2_w"]), "ff2_b": p["ff2_b"].reshape(1, -1),
    }


def prepare_mask_bias(src_mask, heads):
    """One-time (outside jit) mask prep for the flattened-head attention.

    Returns a (B, S, S) f32 value array for the flattened (pos*heads) score matrix:
      0.0    -> keep the computed score
      -1e10  -> src-masked (reference masked_fill value, replaced exactly)
      -1e30  -> cross-head entry (does not exist in the reference; exp underflows to 0)
    """
    src = np.asarray(src_mask)
    B, Sq, head_dim = src.shape
    assert Sq == head_dim, (
        "the module's mask.view(B,1,-1,head_dim) broadcast requires Sq == head_dim "
        "(i.e. S == hidden_size)")
    S = Sq * heads
    i_of = np.arange(S) // heads                 # position index within the head
    h_of = np.arange(S) % heads                  # head index
    same_head = h_of[:, None] == h_of[None, :]                       # (S, S)
    src_keep = src[:, i_of[:, None], i_of[None, :]] != 0             # (B, S, S)
    mask_val = np.where(same_head[None, :, :],
                        np.where(src_keep, 0.0, -1e10),
                        -1e30).astype(np.float32)
    return jnp.asarray(mask_val)


# ------------------------------ reference ------------------------------------ #

def reference_forward(params, x, src_mask, heads):
    S, B, H = x.shape
    head_dim = H // heads
    hp = jax.lax.Precision.HIGHEST

    def lin(t, w, b):
        return jnp.matmul(t, w.T, precision=hp) + b

    q = lin(x, params["wq_w"], params["wq_b"])
    k = lin(x, params["wk_w"], params["wk_b"])
    v = lin(x, params["wv_w"], params["wv_b"])
    q_h = jnp.transpose(jnp.transpose(q, (1, 0, 2)).reshape(B, -1, heads, H), (0, 2, 1, 3))
    k_h = jnp.transpose(jnp.transpose(k, (1, 0, 2)).reshape(B, -1, heads, H), (0, 2, 3, 1))
    v_h = jnp.transpose(jnp.transpose(v, (1, 0, 2)).reshape(B, -1, heads, H), (0, 2, 1, 3))
    energy = jnp.matmul(q_h, k_h, precision=hp) / np.sqrt(head_dim)
    m = jnp.tile(src_mask.reshape(B, 1, -1, head_dim), (1, heads, 1, 1))
    energy = jnp.where(jnp.broadcast_to(m, energy.shape) == 0, -1e10, energy)
    att = jax.nn.softmax(energy, axis=-1)
    v_att = jnp.matmul(att, v_h, precision=hp)
    v_att = jnp.transpose(v_att, (2, 0, 1, 3)).reshape(-1, B, H)
    att_out = lin(v_att, params["fc_w"], params["fc_b"])

    def full_ln(t):
        mu = jnp.mean(t)
        var = jnp.mean((t - mu) ** 2)
        return (t - mu) / jnp.sqrt(var + 1e-5)

    middle = full_ln(att_out + x)
    h = jax.nn.relu(lin(middle, params["ff1_w"], params["ff1_b"]))
    ff = lin(h, params["ff2_w"], params["ff2_b"])
    return full_ln(middle + ff)


# --------------------------------- main --------------------------------------- #

if __name__ == "__main__":
    heads = 8
    S, B, H = 32, 2, 32          # seq-first (S, B, H); S and H divisible by heads
    FF = 64                      # small ff_hidden_size (reference default is 2048)
    head_dim = H // heads        # 4
    Sq = S // heads              # 4 (== head_dim; required by the module's mask reshape)

    key = jax.random.PRNGKey(0)
    kx, km, kp = jax.random.split(key, 3)
    x = jax.random.normal(kx, (S, B, H), jnp.float32)
    # 0/1 src_mask shaped (B, Sq, head_dim): the shape family the original
    # mask.view(B, 1, -1, head_dim) + broadcast accepts for this module.
    src_mask = (jax.random.uniform(km, (B, Sq, head_dim)) > 0.2).astype(jnp.float32)
    params = init_params(kp, H, FF)

    kparams = prepare_params(params)               # weight layout prep, outside jit
    mask_val = prepare_mask_bias(src_mask, heads)  # (B, S, S) mask values, outside jit

    fwd = jax.jit(functools.partial(sub_encoder_forward, heads=heads))
    out = jax.block_until_ready(fwd(kparams, x, mask_val))
    assert out.shape == (S, B, H)

    ref = reference_forward(params, x, src_mask, heads)
    np.testing.assert_allclose(np.asarray(out), np.asarray(ref), atol=2e-2, rtol=2e-2)

    print("KERNEL_OK")
</pallas_src>

<mosaic_0001>
module attributes {stable_mosaic.version = 11 : i64} {
  func.func @_sub_encoder_kernel(%arg0: memref<64x32xf32, #tpu.memory_space<vmem>>, %arg1: memref<32x96xf32, #tpu.memory_space<vmem>>, %arg2: memref<1x96xf32, #tpu.memory_space<vmem>>, %arg3: memref<2x32x32xf32, #tpu.memory_space<vmem>>, %arg4: memref<32x32xf32, #tpu.memory_space<vmem>>, %arg5: memref<1x32xf32, #tpu.memory_space<vmem>>, %arg6: memref<32x64xf32, #tpu.memory_space<vmem>>, %arg7: memref<1x64xf32, #tpu.memory_space<vmem>>, %arg8: memref<64x32xf32, #tpu.memory_space<vmem>>, %arg9: memref<1x32xf32, #tpu.memory_space<vmem>>, %arg10: memref<64x32xf32, #tpu.memory_space<vmem>>) attributes {dimension_semantics = [], scalar_prefetch = 0 : i64, scratch_operands = 0 : i64, tpu.core_type = #tpu.core_type<tc>} {
    %c0 = arith.constant 0 : index
    %c0_0 = arith.constant 0 : index
    %0 = vector.load %arg0[%c0, %c0_0] : memref<64x32xf32, #tpu.memory_space<vmem>>, vector<64x32xf32>
    %c0_1 = arith.constant 0 : index
    %c0_2 = arith.constant 0 : index
    %1 = vector.load %arg1[%c0_1, %c0_2] : memref<32x96xf32, #tpu.memory_space<vmem>>, vector<32x96xf32>
    %cst = arith.constant dense<0.000000e+00> : vector<64x96xf32>
    %2 = tpu.matmul %0, %1, %cst {dimension_numbers = #tpu.dot_dimension_numbers<[1], [0], [0], [1], [0, 0, 1, 1], [], []>} : vector<64x32xf32>, vector<32x96xf32>, vector<64x96xf32> -> vector<64x96xf32>
    %c0_3 = arith.constant 0 : index
    %c0_4 = arith.constant 0 : index
    %3 = vector.load %arg2[%c0_3, %c0_4] : memref<1x96xf32, #tpu.memory_space<vmem>>, vector<1x96xf32>
    %4 = vector.broadcast %3 : vector<1x96xf32> to vector<64x96xf32>
    %5 = arith.addf %2, %4 : vector<64x96xf32>
    %6 = vector.shape_cast %5 : vector<64x96xf32> to vector<32x2x96xf32>
    %7 = tpu.transpose %6, [1, 0, 2] : vector<32x2x96xf32> -> vector<2x32x96xf32>
    %8 = vector.extract_strided_slice %7 {offsets = [0, 0, 0], sizes = [2, 32, 32], strides = [1, 1, 1]} : vector<2x32x96xf32> to vector<2x32x32xf32>
    %9 = vector.extract_strided_slice %7 {offsets = [0, 0, 32], sizes = [2, 32, 32], strides = [1, 1, 1]} : vector<2x32x96xf32> to vector<2x32x32xf32>
    %10 = vector.extract_strided_slice %7 {offsets = [0, 0, 64], sizes = [2, 32, 32], strides = [1, 1, 1]} : vector<2x32x96xf32> to vector<2x32x32xf32>
    "tpu.trace_start"() <{level = 10 : i32, message = "bsd,btd->bst"}> : () -> ()
    %cst_5 = arith.constant dense<0.000000e+00> : vector<2x32x32xf32>
    %11 = tpu.matmul %8, %9, %cst_5 {dimension_numbers = #tpu.dot_dimension_numbers<[2], [2], [1], [1], [0, 0, 0, 1, 1, 1], [0], [0]>} : vector<2x32x32xf32>, vector<2x32x32xf32>, vector<2x32x32xf32> -> vector<2x32x32xf32>
    "tpu.trace_stop"() : () -> ()
    %cst_6 = arith.constant 5.000000e-01 : f32
    %12 = vector.broadcast %cst_6 : f32 to vector<2x32x32xf32>
    %13 = arith.mulf %11, %12 : vector<2x32x32xf32>
    %c0_7 = arith.constant 0 : index
    %c0_8 = arith.constant 0 : index
    %c0_9 = arith.constant 0 : index
    %14 = vector.load %arg3[%c0_7, %c0_8, %c0_9] : memref<2x32x32xf32, #tpu.memory_space<vmem>>, vector<2x32x32xf32>
    %cst_10 = arith.constant 0.000000e+00 : f32
    %15 = vector.broadcast %cst_10 : f32 to vector<2x32x32xf32>
    %16 = arith.cmpf olt, %14, %15 : vector<2x32x32xf32>
    %17 = arith.select %16, %14, %13 : vector<2x32x32xi1>, vector<2x32x32xf32>
    %cst_11 = arith.constant dense<0xFF800000> : vector<2x32xf32>
    %18 = vector.multi_reduction <maximumf>, %17, %cst_11 [2] : vector<2x32x32xf32> to vector<2x32xf32>
    %19 = vector.shape_cast %18 : vector<2x32xf32> to vector<2x32x1xf32>
    %20 = vector.broadcast %19 : vector<2x32x1xf32> to vector<2x32x32xf32>
    %21 = arith.subf %17, %20 : vector<2x32x32xf32>
    %22 = math.exp %21 : vector<2x32x32xf32>
    %cst_12 = arith.constant dense<0.000000e+00> : vector<2x32xf32>
    %23 = vector.multi_reduction <add>, %22, %cst_12 [2] : vector<2x32x32xf32> to vector<2x32xf32>
    %24 = vector.shape_cast %23 : vector<2x32xf32> to vector<2x32x1xf32>
    %25 = vector.broadcast %24 : vector<2x32x1xf32> to vector<2x32x32xf32>
    %26 = arith.divf %22, %25 : vector<2x32x32xf32>
    "tpu.trace_start"() <{level = 10 : i32, message = "bst,btd->bsd"}> : () -> ()
    %cst_13 = arith.constant dense<0.000000e+00> : vector<2x32x32xf32>
    %27 = tpu.matmul %26, %10, %cst_13 {dimension_numbers = #tpu.dot_dimension_numbers<[2], [1], [1], [2], [0, 0, 0, 1, 1, 2], [0], [0]>} : vector<2x32x32xf32>, vector<2x32x32xf32>, vector<2x32x32xf32> -> vector<2x32x32xf32>
    "tpu.trace_stop"() : () -> ()
    %28 = vector.shape_cast %27 : vector<2x32x32xf32> to vector<2x4x8x32xf32>
    %29 = tpu.transpose %28, [1, 0, 2, 3] : vector<2x4x8x32xf32> -> vector<4x2x8x32xf32>
    %30 = vector.shape_cast %29 : vector<4x2x8x32xf32> to vector<64x32xf32>
    %c0_14 = arith.constant 0 : index
    %c0_15 = arith.constant 0 : index
    %31 = vector.load %arg4[%c0_14, %c0_15] : memref<32x32xf32, #tpu.memory_space<vmem>>, vector<32x32xf32>
    %cst_16 = arith.constant dense<0.000000e+00> : vector<64x32xf32>
    %32 = tpu.matmul %30, %31, %cst_16 {dimension_numbers = #tpu.dot_dimension_numbers<[1], [0], [0], [1], [0, 0, 1, 1], [], []>} : vector<64x32xf32>, vector<32x32xf32>, vector<64x32xf32> -> vector<64x32xf32>
    %c0_17 = arith.constant 0 : index
    %c0_18 = arith.constant 0 : index
    %33 = vector.load %arg5[%c0_17, %c0_18] : memref<1x32xf32, #tpu.memory_space<vmem>>, vector<1x32xf32>
    %34 = vector.broadcast %33 : vector<1x32xf32> to vector<64x32xf32>
    %35 = arith.addf %32, %34 : vector<64x32xf32>
    %36 = arith.addf %35, %0 : vector<64x32xf32>
    %37 = vector.shape_cast %36 : vector<64x32xf32> to vector<1x64x32xf32>
    %cst_19 = arith.constant dense<0.000000e+00> : vector<1xf32>
    %38 = vector.multi_reduction <add>, %37, %cst_19 [1, 2] : vector<1x64x32xf32> to vector<1xf32>
    %39 = vector.shape_cast %38 : vector<1xf32> to vector<1x1x1xf32>
    %40 = vector.extract %39[0, 0, 0] : f32 from vector<1x1x1xf32>
    %cst_20 = arith.constant 2.048000e+03 : f32
    %41 = arith.divf %40, %cst_20 : f32
    %42 = vector.broadcast %41 : f32 to vector<64x32xf32>
    %43 = arith.subf %36, %42 : vector<64x32xf32>
    %44 = arith.mulf %43, %43 : vector<64x32xf32>
    %45 = vector.shape_cast %44 : vector<64x32xf32> to vector<1x64x32xf32>
    %cst_21 = arith.constant dense<0.000000e+00> : vector<1xf32>
    %46 = vector.multi_reduction <add>, %45, %cst_21 [1, 2] : vector<1x64x32xf32> to vector<1xf32>
    %47 = vector.shape_cast %46 : vector<1xf32> to vector<1x1x1xf32>
    %48 = vector.extract %47[0, 0, 0] : f32 from vector<1x1x1xf32>
    %cst_22 = arith.constant 2.048000e+03 : f32
    %49 = arith.divf %48, %cst_22 : f32
    %50 = vector.broadcast %41 : f32 to vector<64x32xf32>
    %51 = arith.subf %36, %50 : vector<64x32xf32>
    %cst_23 = arith.constant 9.99999974E-6 : f32
    %52 = arith.addf %49, %cst_23 : f32
    %53 = math.rsqrt %52 : f32
    %54 = vector.broadcast %53 : f32 to vector<64x32xf32>
    %55 = arith.mulf %51, %54 : vector<64x32xf32>
    %c0_24 = arith.constant 0 : index
    %c0_25 = arith.constant 0 : index
    %56 = vector.load %arg6[%c0_24, %c0_25] : memref<32x64xf32, #tpu.memory_space<vmem>>, vector<32x64xf32>
    %cst_26 = arith.constant dense<0.000000e+00> : vector<64x64xf32>
    %57 = tpu.matmul %55, %56, %cst_26 {dimension_numbers = #tpu.dot_dimension_numbers<[1], [0], [0], [1], [0, 0, 1, 1], [], []>} : vector<64x32xf32>, vector<32x64xf32>, vector<64x64xf32> -> vector<64x64xf32>
    %c0_27 = arith.constant 0 : index
    %c0_28 = arith.constant 0 : index
    %58 = vector.load %arg7[%c0_27, %c0_28] : memref<1x64xf32, #tpu.memory_space<vmem>>, vector<1x64xf32>
    %59 = vector.broadcast %58 : vector<1x64xf32> to vector<64x64xf32>
    %60 = arith.addf %57, %59 : vector<64x64xf32>
    %cst_29 = arith.constant 0.000000e+00 : f32
    %61 = vector.broadcast %cst_29 : f32 to vector<64x64xf32>
    %62 = arith.maximumf %60, %61 : vector<64x64xf32>
    %c0_30 = arith.constant 0 : index
    %c0_31 = arith.constant 0 : index
    %63 = vector.load %arg8[%c0_30, %c0_31] : memref<64x32xf32, #tpu.memory_space<vmem>>, vector<64x32xf32>
    %cst_32 = arith.constant dense<0.000000e+00> : vector<64x32xf32>
    %64 = tpu.matmul %62, %63, %cst_32 {dimension_numbers = #tpu.dot_dimension_numbers<[1], [0], [0], [1], [0, 0, 1, 1], [], []>} : vector<64x64xf32>, vector<64x32xf32>, vector<64x32xf32> -> vector<64x32xf32>
    %c0_33 = arith.constant 0 : index
    %c0_34 = arith.constant 0 : index
    %65 = vector.load %arg9[%c0_33, %c0_34] : memref<1x32xf32, #tpu.memory_space<vmem>>, vector<1x32xf32>
    %66 = vector.broadcast %65 : vector<1x32xf32> to vector<64x32xf32>
    %67 = arith.addf %64, %66 : vector<64x32xf32>
    %68 = arith.addf %55, %67 : vector<64x32xf32>
    %69 = vector.shape_cast %68 : vector<64x32xf32> to vector<1x64x32xf32>
    %cst_35 = arith.constant dense<0.000000e+00> : vector<1xf32>
    %70 = vector.multi_reduction <add>, %69, %cst_35 [1, 2] : vector<1x64x32xf32> to vector<1xf32>
    %71 = vector.shape_cast %70 : vector<1xf32> to vector<1x1x1xf32>
    %72 = vector.extract %71[0, 0, 0] : f32 from vector<1x1x1xf32>
    %cst_36 = arith.constant 2.048000e+03 : f32
    %73 = arith.divf %72, %cst_36 : f32
    %74 = vector.broadcast %73 : f32 to vector<64x32xf32>
    %75 = arith.subf %68, %74 : vector<64x32xf32>
    %76 = arith.mulf %75, %75 : vector<64x32xf32>
    %77 = vector.shape_cast %76 : vector<64x32xf32> to vector<1x64x32xf32>
    %cst_37 = arith.constant dense<0.000000e+00> : vector<1xf32>
    %78 = vector.multi_reduction <add>, %77, %cst_37 [1, 2] : vector<1x64x32xf32> to vector<1xf32>
    %79 = vector.shape_cast %78 : vector<1xf32> to vector<1x1x1xf32>
    %80 = vector.extract %79[0, 0, 0] : f32 from vector<1x1x1xf32>
    %cst_38 = arith.constant 2.048000e+03 : f32
    %81 = arith.divf %80, %cst_38 : f32
    %82 = vector.broadcast %73 : f32 to vector<64x32xf32>
    %83 = arith.subf %68, %82 : vector<64x32xf32>
    %cst_39 = arith.constant 9.99999974E-6 : f32
    %84 = arith.addf %81, %cst_39 : f32
    %85 = math.rsqrt %84 : f32
    %86 = vector.broadcast %85 : f32 to vector<64x32xf32>
    %87 = arith.mulf %83, %86 : vector<64x32xf32>
    %c0_40 = arith.constant 0 : index
    %c0_41 = arith.constant 0 : index
    %88 = vector.load %arg10[%c0_40, %c0_41] : memref<64x32xf32, #tpu.memory_space<vmem>>, vector<64x32xf32>
    tpu.vector_store %arg10[%c0_40, %c0_41], %87 {strides = array<i32>} : memref<64x32xf32, #tpu.memory_space<vmem>>, vector<64x32xf32>,
    return
  }
}

</mosaic_0001>

<bundles_post_ra>
// kernel: sub_encoder_forward.1
= control target key start
LH: loop header
LB: loop body
LE: loop exit
PB: predicated region body
PF: predicated region fallthrough
CT: control target
= control target key end

     0   :  { %15 = vsyncpa [#allocation3], 0  ;;  %s3157_s0 = inlined_call_operand.vmem [shape: f32[64,32], index: 0, kind: input, shape index: {}]   ;;  %s3158_s1 = inlined_call_operand.hbm [shape: f32[32,96], index: 1, kind: input, shape index: {}]   ;;  %s3159_s2 = inlined_call_operand.vmem [shape: f32[1,96], index: 2, kind: input, shape index: {}]   ;;  %s3160_s3 = inlined_call_operand.vmem [shape: f32[2,32,32], index: 3, kind: input, shape index: {}]   ;;  %s3161_s4 = inlined_call_operand.hbm [shape: f32[32,32], index: 4, kind: input, shape index: {}]   ;;  %s3162_s5 = inlined_call_operand.vmem [shape: f32[1,32], index: 5, kind: input, shape index: {}]   ;;  %s3163_s6 = inlined_call_operand.hbm [shape: f32[32,64], index: 6, kind: input, shape index: {}]   ;;  %s3164_s7 = inlined_call_operand.hbm [shape: f32[1,64], index: 7, kind: input, shape index: {}]   ;;  %s3165_s8 = inlined_call_operand.vmem [shape: f32[64,32], index: 8, kind: input, shape index: {}]   ;;  %s3166_s9 = inlined_call_operand.hbm [shape: f32[1,32], index: 9, kind: input, shape index: {}]   ;;  %s3167_s10 = inlined_call_operand.hbm [shape: f32[64,32], index: 10, kind: output, shape index: {}]  }
   0x1   :  { %16 = vsyncpa [#allocation6], 0 }
   0x2   :  { %17 = vsyncpa [#allocation9], 0 }
   0x3   :  { %18 = vsyncpa [#allocation4], 0  ;;  %s2561_s13 = smov [#allocation5]   ;;  %s2562_s15 = smov [#allocation8]  }
   0x4   :  { %s42_s14 = sshll.u32 %s2561_s13, 4  ;;  %s69_s16 = sshll.u32 %s2562_s15, 4  ;;  %s43_s14 = int_to_ptr.vmem [resolvable:$true] %s42_s14  ;;  %s2628_s16 = int_to_ptr.vmem [resolvable:$true] %s69_s16 }
   0x5   :  { %s2421_s19 = scalar_lea.hbm %s3161_s4, 512 }
   0x6   :  { %p2422_p0 = scmp.ne.s32.totalorder %s3161_s4, %s2421_s19  ;;  %p2425_p1 = scmp.lt.u32.totalorder %s2421_s19, %s3161_s4 }
   0x8   :  { %p2427_p2 = pnand %p2425_p1, %p2422_p0 }
   0xa   :  { %2430 = shalt.err (!%p2427_p2)
}
   0xb   :  { %s2431_s24 = scalar_lea.vmem %s43_s14, 512  ;;  %p2436_p4 = scmp.lt.s32.totalorder %s43_s14, %s43_s14 }
   0xc   :  { %p2432_p3 = scmp.ne.s32.totalorder %s43_s14, %s2431_s24  ;;  %p2437_p5 = scmp.lt.s32.totalorder %s2431_s24, %s2431_s24 }
   0xe   :  { %p2438_p6 = por %p2437_p5, %p2436_p4 }
  0x10   :  { %p2439_p7 = pnand %p2438_p6, %p2432_p3 }
  0x12   :  { %2442 = shalt.err (!%p2439_p7)
}
  0x13   :  { %s2563_s25 = smov 128   ;;  %s2564_s26 = smov 8  }
  0x14   :  { %48 = dma.hbm_to_vmem [thread:$0]  %s3161_s4, 512, %s43_s14, [#allocation6], %s2563_s25, %s2563_s25, %s2564_s26  }
  0x15   :  { %s2443_s11 = scalar_lea.hbm %s3164_s7, 16 }
  0x16   :  { %p2444_p8 = scmp.ne.s32.totalorder %s3164_s7, %s2443_s11  ;;  %p2447_p9 = scmp.lt.u32.totalorder %s2443_s11, %s3164_s7 }
  0x18   :  { %p2449_p10 = pnand %p2447_p9, %p2444_p8 }
  0x1a   :  { %2452 = shalt.err (!%p2449_p10)
}
  0x1b   :  { %s2453_s18 = scalar_lea.vmem %s2628_s16, 16  ;;  %s2457_s4 = scalar_lea.vmem %s2628_s16, 32 }
  0x1c   :  { %p2454_p11 = scmp.ne.s32.totalorder %s2628_s16, %s2453_s18  ;;  %p2458_p12 = scmp.lt.s32.totalorder %s2628_s16, %s2628_s16 }
  0x1d   :  { %p2459_p13 = scmp.lt.s32.totalorder %s2457_s4, %s2453_s18 }
  0x1f   :  { %p2460_p0 = por %p2459_p13, %p2458_p12 }
  0x21   :  { %p2461_p1 = pnand %p2460_p0, %p2454_p11 }
  0x23   :  { %2464 = shalt.err (!%p2461_p1)
}
  0x24   :  { %72 = dma.hbm_to_vmem [thread:$0]  %s3164_s7, 16, %s2628_s16, [#allocation9]  }
  0x25   :  { %s2565_s20 = smov [#allocation2]   ;;  %s2566_s22 = smov [#allocation7]  }
  0x26   :  { %s26_s21 = sshll.u32 %s2565_s20, 4  ;;  %s56_s23 = sshll.u32 %s2566_s22, 4  ;;  %s27_s21 = int_to_ptr.vmem [resolvable:$true] %s26_s21  ;;  %s2663_s23 = int_to_ptr.vmem [resolvable:$true] %s56_s23 }
  0x27   :  { %s2465_s28 = scalar_lea.hbm %s3158_s1, 512 }
  0x28   :  { %p2466_p2 = scmp.ne.s32.totalorder %s3158_s1, %s2465_s28  ;;  %p2469_p3 = scmp.lt.u32.totalorder %s2465_s28, %s3158_s1 }
  0x2a   :  { %p2471_p4 = pnand %p2469_p3, %p2466_p2 }
  0x2c   :  { %2474 = shalt.err (!%p2471_p4)
}
  0x2d   :  { %s2475_s7 = scalar_lea.vmem %s27_s21, 512  ;;  %p2480_p6 = scmp.lt.s32.totalorder %s27_s21, %s27_s21 }
  0x2e   :  { %p2476_p5 = scmp.ne.s32.totalorder %s27_s21, %s2475_s7  ;;  %p2481_p7 = scmp.lt.s32.totalorder %s2475_s7, %s2475_s7 }
  0x30   :  { %p2482_p8 = por %p2481_p7, %p2480_p6 }
  0x32   :  { %p2483_p9 = pnand %p2482_p8, %p2476_p5 }
  0x34   :  { %2486 = shalt.err (!%p2483_p9)
}
  0x35   :  { %32 = dma.hbm_to_vmem [thread:$0]  %s3158_s1, 512, %s27_s21, [#allocation3], %s2563_s25, %s2563_s25, %s2564_s26  }
  0x36   :  { %s2487_s18 = scalar_lea.hbm %s3163_s6, 512 }
  0x37   :  { %p2488_p10 = scmp.ne.s32.totalorder %s3163_s6, %s2487_s18  ;;  %p2491_p11 = scmp.lt.u32.totalorder %s2487_s18, %s3163_s6 }
  0x39   :  { %p2493_p12 = pnand %p2491_p11, %p2488_p10 }
  0x3b   :  { %2496 = shalt.err (!%p2493_p12)
}
  0x3c   :  { %s2497_s22 = scalar_lea.vmem %s2663_s23, 512  ;;  %p2502_p0 = scmp.lt.s32.totalorder %s2663_s23, %s2663_s23 }
  0x3d   :  { %p2498_p13 = scmp.ne.s32.totalorder %s2663_s23, %s2497_s22  ;;  %p2503_p1 = scmp.lt.s32.totalorder %s2497_s22, %s2497_s22 }
  0x3f   :  { %p2504_p2 = por %p2503_p1, %p2502_p0 }
  0x41   :  { %p2505_p3 = pnand %p2504_p2, %p2498_p13 }
  0x43   :  { %2508 = shalt.err (!%p2505_p3)
}
  0x44   :  { %62 = dma.hbm_to_vmem [thread:$0]  %s3163_s6, 512, %s2663_s23, [#allocation6], %s2563_s25, %s2563_s25, %s2564_s26  }
  0x45   :  { %s2567_s24 = smov [#allocation10]   ;;  %s2509_s30 = scalar_lea.hbm %s3166_s9, 16 }
  0x46   :  { %s81_s27 = sshll.u32 %s2567_s24, 4  ;;  %p2510_p4 = scmp.ne.s32.totalorder %s3166_s9, %s2509_s30  ;;  %s82_s27 = int_to_ptr.vmem [resolvable:$true] %s81_s27 }
  0x47   :  { %p2513_p5 = scmp.lt.u32.totalorder %s2509_s30, %s3166_s9 }
  0x49   :  { %p2515_p6 = pnand %p2513_p5, %p2510_p4 }
  0x4b   :  { %2518 = shalt.err (!%p2515_p6)
}
  0x4c   :  { %s2519_s13 = scalar_lea.vmem %s82_s27, 16  ;;  %s2523_s6 = scalar_lea.vmem %s82_s27, 32 }
  0x4d   :  { %p2520_p7 = scmp.ne.s32.totalorder %s82_s27, %s2519_s13  ;;  %p2524_p8 = scmp.lt.s32.totalorder %s82_s27, %s82_s27 }
  0x4e   :  { %p2525_p9 = scmp.lt.s32.totalorder %s2523_s6, %s2519_s13 }
  0x50   :  { %p2526_p10 = por %p2525_p9, %p2524_p8 }
  0x52   :  { %p2527_p11 = pnand %p2526_p10, %p2520_p7 }
  0x54   :  { %2530 = shalt.err (!%p2527_p11)
}
  0x55   :  { %84 = dma.hbm_to_vmem [thread:$0]  %s3166_s9, 16, %s82_s27, [#allocation9]  }
  0x56   :  { %2553 = dma.done.wait [#allocation3], 512  }
  0x57   :  { %2554 = vsyncadd [#allocation3], 4294966784 }
  0x58   :  { %2555 = dma.done.wait [#allocation6], 1024  }
  0x59   :  { %2556 = vsyncadd [#allocation6], 4294966272 }
  0x5a   :  { %2557 = dma.done.wait [#allocation9], 32  }
  0x5b   :  { %2558 = vsyncadd [#allocation9], 4294967264  ;;  %vm119_vm0 = vcmask 261120   ;;  %v108_v0 = vld [vmem:[#allocation2] sm:$0xff]  ;;  %v109_v1 = vld [vmem:[#allocation2 + $0x8] sm:$0xff]  ;;  %v261_v16 = vlaneseq  ;;  %s2571_s24 = smov 64  }
  0x5c   :  { %v110_v2 = vld [vmem:[#allocation2 + $0x10] sm:$0xff]  ;;  %v2233_v3 = vpack.c.bf16 %v109_v1, %v108_v0  ;;  %v111_v4 = vld [vmem:[#allocation2 + $0x18] sm:$0xff]  ;;  %v2715_v5 = vld [vmem:[%s3157_s0] sm:$0xff]  ;;  %v2568_v14 = vmov 1983009808   ;;  %vm1688_vm10 = vcmask 523264  }
  0x5d   :  { %v2237_v6 = vpack.c.bf16 %v111_v4, %v110_v2  ;;  %2097 = vmatprep.mubr.msk.f32.mxu0 %vm119_vm0, %v2715_v5  ;;  %v2722_v7 = vld [vmem:[%s3157_s0 + $0x8] sm:$0xff]  ;;  %v2727_v8 = vld [vmem:[%s3157_s0 + $0x10] sm:$0xff]  ;;  %v2736_v9 = vld [vmem:[%s3157_s0 + $0x18] sm:$0xff]  ;;  %v259_v15 = vunpack.c.l.s4 %v2568_v14  ;;  %v262_v18 = vshrl.u32 %v261_v16, 7  ;;  %v2569_v19 = vmov 1934713408  }
  0x5e   :  { %2234 = vmatprep.subr.bf16.mxu0 %v2233_v3  ;;  %v2741_v10 = vld [vmem:[%s3157_s0 + $0x20] sm:$0xff]  ;;  %v2750_v11 = vld [vmem:[%s3157_s0 + $0x28] sm:$0xff]  ;;  %v2755_v12 = vld [vmem:[%s3157_s0 + $0x30] sm:$0xff]  ;;  %v427_v20 = vunpack.c.l.s4 %v2569_v19 }
  0x5f   :  { %2236 = vmatpush3.bf16.msra.mxu0 %v2233_v3  ;;  %v2764_v13 = vld [vmem:[%s3157_s0 + $0x38] sm:$0xff]  ;;  %v260_v17 = vunpack.c.0.s8 %v259_v15  ;;  %v2771_v21 = vld [vmem:[%s3159_s2] ss:$0 sm:$0xff]  ;;  %s2570_s0 = smov 96   ;;  %vm2869_vm1 = vmpackc.low %vm119_vm0, %vm119_vm0 }
  0x60   :  { %2238 = vmatprep.subr.bf16.mxu0 %v2237_v6  ;;  %v428_v25 = vunpack.c.0.s8 %v427_v20 }
  0x61   :  { %v2773_v22 = vsub.s32 %v260_v17, %v262_v18 }
  0x62   :  { %v2780_v35 = vsub.s32 %v428_v25, %v262_v18 }
  0x63   :  { %2240 = vmatpush3.bf16.msra.mxu0 %v2237_v6 }
  0x66   :  { %2098 = vmatmul.mubr.msk.f32.vlgmr.msra.gmra.mrb[0].mxu0 %vm119_vm0, %v2722_v7 }
  0x67   :  { %2100 = vmatprep.mubr.msk.f32.mxu0 %vm119_vm0, %v2727_v8 }
  0x6a   :  { %2101 = vmatmul.mubr.msk.f32.gmra.mrb[2].mxu0 %vm119_vm0, %v2736_v9 }
  0x6b   :  { %2103 = vmatprep.mubr.msk.f32.mxu0 %vm119_vm0, %v2741_v10 }
  0x6e   :  { %2104 = vmatmul.mubr.msk.f32.gmra.mrb[4].mxu0 %vm119_vm0, %v2750_v11 }
  0x6f   :  { %2106 = vmatprep.mubr.msk.f32.mxu0 %vm119_vm0, %v2755_v12 }
  0x72   :  { %2107 = vmatmul.mubr.msk.f32.gmra.mrb[6].mxu0 %vm119_vm0, %v2764_v13 }
 0x139   :  { %v2099_v23 = vpop.f32.mrb[0].mxu0 }
 0x13a   :  { %v216_v24 = vadd.f32 %v2099_v23, %v2771_v21  ;;  %v210_v26 = vpop.f32.mrb[1].mxu0 }
 0x13b   :  { %v211_v27 = vadd.f32 %v2771_v21, %v210_v26 }
 0x13c   :  { %v274_v28 = vcombine.high %v216_v24, %v216_v24  ;;  %v281_v29 = vrot.slane %v216_v24, %v2773_v22 }
 0x13d   :  { %v257_v30 = vcombine.high %v211_v27, %v211_v27  ;;  %v264_v31 = vrot.slane %v211_v27, %v2773_v22  ;;  %v2102_v32 = vpop.f32.mrb[2].mxu0 }
 0x13e   :  { %v288_v33 = vrot.slane %v274_v28, %v2773_v22  ;;  %v289_v34 = vcombine.high %v281_v29, %v281_v29  ;;  %v226_v36 = vadd.f32 %v2102_v32, %v2771_v21  ;;  %v220_v37 = vpop.f32.mrb[3].mxu0 }
 0x13f   :  { %v271_v38 = vrot.slane %v257_v30, %v2773_v22  ;;  %v272_v39 = vcombine.high %v264_v31, %v264_v31  ;;  %v221_v40 = vadd.f32 %v2771_v21, %v220_v37 }
 0x140   :  { %v290_v41 = vcombine.high %v288_v33, %v288_v33  ;;  %v443_v42 = vcombine.low %v281_v29, %v289_v34  ;;  %v308_v43 = vcombine.high %v226_v36, %v226_v36  ;;  %v315_v44 = vrot.slane %v226_v36, %v2773_v22 }
 0x141   :  { %v273_v45 = vcombine.high %v271_v38, %v271_v38  ;;  %v425_v46 = vcombine.low %v264_v31, %v272_v39  ;;  %v291_v47 = vcombine.high %v221_v40, %v221_v40  ;;  %v298_v48 = vrot.slane %v221_v40, %v2773_v22  ;;  %v2105_v49 = vpop.f32.mrb[4].mxu0 }
 0x142   :  { %v2788_v50 = vrot.slane %v443_v42, %v2780_v35  ;;  %v452_v51 = vcombine.low %v288_v33, %v290_v41  ;;  %v322_v52 = vrot.slane %v308_v43, %v2773_v22  ;;  %v323_v53 = vcombine.high %v315_v44, %v315_v44  ;;  %v230_v54 = vpop.f32.mrb[5].mxu0 }
 0x143   :  { %v2792_v55 = vrot.slane %v425_v46, %v2780_v35  ;;  %v434_v56 = vcombine.low %v271_v38, %v273_v45  ;;  %v305_v57 = vrot.slane %v291_v47, %v2773_v22  ;;  %v306_v58 = vcombine.high %v298_v48, %v298_v48 }
 0x144   :  { %v2796_v59 = vrot.slane %v452_v51, %v2780_v35  ;;  %v324_v60 = vcombine.high %v322_v52, %v322_v52  ;;  %v479_v61 = vcombine.low %v315_v44, %v323_v53  ;;  %v236_v62 = vadd.f32 %v2105_v49, %v2771_v21 }
 0x145   :  { %v2800_v63 = vrot.slane %v434_v56, %v2780_v35  ;;  %v307_v0 = vcombine.high %v305_v57, %v305_v57  ;;  %v461_v1 = vcombine.low %v298_v48, %v306_v58  ;;  %v231_v2 = vadd.f32 %v2771_v21, %v230_v54  ;;  %v2108_v3 = vpop.f32.mrb[6].mxu0 }
 0x146   :  { %v1955_v4 = vcombine.high %v2788_v50, %v2796_v59  ;;  %v2806_v6 = vrot.slane %v479_v61, %v2780_v35  ;;  %v488_v14 = vcombine.low %v322_v52, %v324_v60  ;;  %v342_v15 = vcombine.high %v236_v62, %v236_v62  ;;  %v240_v16 = vpop.f32.mrb[7].mxu0 }
 0x147   :  { %v1954_v17 = vcombine.high %v2792_v55, %v2800_v63  ;;  %v468_v18 = vrot.slane %v461_v1, %v2780_v35  ;;  %v470_v19 = vcombine.low %v305_v57, %v307_v0  ;;  %v349_v20 = vrot.slane %v236_v62, %v2773_v22 }
 0x148   :  { %v495_v23 = vrot.slane %v488_v14, %v2780_v35  ;;  %v356_v24 = vrot.slane %v342_v15, %v2773_v22  ;;  %v325_v25 = vcombine.high %v231_v2, %v231_v2  ;;  %v332_v26 = vrot.slane %v231_v2, %v2773_v22 }
 0x149   :  { %v477_v27 = vrot.slane %v470_v19, %v2780_v35  ;;  %v357_v28 = vcombine.high %v349_v20, %v349_v20  ;;  %v246_v29 = vadd.f32 %v2108_v3, %v2771_v21  ;;  %v241_v30 = vadd.f32 %v2771_v21, %v240_v16 }
 0x14a   :  { %v603_v31 = vcombine.low %v2806_v6, %v495_v23  ;;  %v1957_v32 = vcombine.high %v2806_v6, %v495_v23  ;;  %v358_v33 = vcombine.high %v356_v24, %v356_v24  ;;  %v339_v34 = vrot.slane %v325_v25, %v2773_v22 }
 0x14b   :  { %v602_v36 = vcombine.low %v468_v18, %v477_v27  ;;  %v1956_v37 = vcombine.high %v468_v18, %v477_v27  ;;  %v515_v38 = vcombine.low %v349_v20, %v357_v28  ;;  %v340_v39 = vcombine.high %v332_v26, %v332_v26 }
 0x14c   :  { %v524_v40 = vcombine.low %v356_v24, %v358_v33  ;;  %v341_v41 = vcombine.high %v339_v34, %v339_v34  ;;  %v376_v42 = vcombine.high %v246_v29, %v246_v29  ;;  %v383_v43 = vrot.slane %v246_v29, %v2773_v22 }
 0x14d   :  { %v522_v44 = vrot.slane %v515_v38, %v2780_v35  ;;  %v497_v45 = vcombine.low %v332_v26, %v340_v39  ;;  %v359_v21 = vcombine.high %v241_v30, %v241_v30  ;;  %v366_v46 = vrot.slane %v241_v30, %v2773_v22 }
 0x14e   :  { %v531_v47 = vrot.slane %v524_v40, %v2780_v35  ;;  %v506_v48 = vcombine.low %v339_v34, %v341_v41  ;;  %v390_v49 = vrot.slane %v376_v42, %v2773_v22  ;;  %v391_v51 = vcombine.high %v383_v43, %v383_v43 }
 0x14f   :  { %v504_v52 = vrot.slane %v497_v45, %v2780_v35  ;;  %v373_v53 = vrot.slane %v359_v21, %v2773_v22  ;;  %v374_v54 = vcombine.high %v366_v46, %v366_v46  ;;  %v585_v56 = vcombine.low %v2792_v55, %v2800_v63 }
 0x150   :  { %v620_v57 = vcombine.low %v522_v44, %v531_v47  ;;  %v1959_v58 = vcombine.high %v522_v44, %v531_v47  ;;  %v513_v60 = vrot.slane %v506_v48, %v2780_v35  ;;  %v392_v61 = vcombine.high %v390_v49, %v390_v49 }
 0x151   :  { %v551_v62 = vcombine.low %v383_v43, %v391_v51  ;;  %v375_v0 = vcombine.high %v373_v53, %v373_v53  ;;  %v533_v1 = vcombine.low %v366_v46, %v374_v54  ;;  %v586_v2 = vcombine.low %v2788_v50, %v2796_v59 }
 0x152   :  { %v619_v3 = vcombine.low %v504_v52, %v513_v60  ;;  %v1958_v6 = vcombine.high %v504_v52, %v513_v60  ;;  %v560_v14 = vcombine.low %v390_v49, %v392_v61  ;;  %v593_v15 = vrot.slane %v585_v56, %v2773_v22 }
 0x153   :  { %v558_v16 = vrot.slane %v551_v62, %v2780_v35  ;;  %v540_v55 = vrot.slane %v533_v1, %v2780_v35  ;;  %v542_v63 = vcombine.low %v373_v53, %v375_v0  ;;  %v600_v18 = vrot.slane %v586_v2, %v2773_v22 }
 0x154   :  { %v567_v19 = vrot.slane %v560_v14, %v2780_v35  ;;  %v786_v20 = vrot.slane %v1954_v17, %v2773_v22  ;;  %v793_v23 = vrot.slane %v1955_v4, %v2773_v22  ;;  %v610_v50 = vrot.slane %v602_v36, %v2773_v22  ;;  %v963_v14 = vld [vmem:[%s3160_s3] sm:$0xff] }
 0x155   :  { %v549_v59 = vrot.slane %v542_v63, %v2780_v35  ;;  %v601_v24 = vcombine.low %v593_v15, %v600_v18  ;;  %v617_v25 = vrot.slane %v603_v31, %v2773_v22  ;;  %v803_v26 = vrot.slane %v1956_v37, %v2773_v22  ;;  %v967_v18 = vld [vmem:[%s3160_s3 + $0x20] sm:$0xff] }
 0x156   :  { %v637_v27 = vcombine.low %v558_v16, %v567_v19  ;;  %v1961_v28 = vcombine.high %v558_v16, %v567_v19  ;;  %v794_v29 = vcombine.low %v786_v20, %v793_v23  ;;  %v810_v30 = vrot.slane %v1957_v32, %v2773_v22  ;;  %v965_v19 = vld [vmem:[%s3160_s3 + $0x10] sm:$0xff] }
 0x157   :  { %v636_v33 = vcombine.low %v540_v55, %v549_v59  ;;  %v1960_v34 = vcombine.high %v540_v55, %v549_v59  ;;  %2117 = vmatprep.mubr.msk.f32.mxu1 %vm119_vm0, %v601_v24  ;;  %v618_v17 = vcombine.low %v610_v50, %v617_v25  ;;  %v627_v4 = vrot.slane %v619_v3, %v2773_v22  ;;  %v968_v25 = vld [vmem:[%s3160_s3 + $0x28] sm:$0xff] }
 0x158   :  { %2131 = vmatprep.mubr.msk.f32.mxu0 %vm119_vm0, %v794_v29  ;;  %v811_v35 = vcombine.low %v803_v26, %v810_v30  ;;  %v634_v36 = vrot.slane %v620_v57, %v2773_v22  ;;  %v651_v31 = vrot.slane %v637_v27, %v2773_v22  ;;  %v820_v37 = vrot.slane %v1958_v6, %v2773_v22  ;;  %v964_v6 = vld [vmem:[%s3160_s3 + $0x8] sm:$0xff] }
 0x159   :  { %v2851_v38 = vpack.i.bf16 %v618_v17, %v601_v24  ;;  %v644_v32 = vrot.slane %v636_v33, %v2773_v22  ;;  %v827_v39 = vrot.slane %v1959_v58, %v2773_v22  ;;  %v837_v40 = vrot.slane %v1960_v34, %v2773_v22  ;;  %v969_v34 = vld [vmem:[%s3160_s3 + $0x30] sm:$0xff] }
 0x15a   :  { %v635_v41 = vcombine.low %v627_v4, %v634_v36  ;;  %v844_v42 = vrot.slane %v1961_v28, %v2773_v22  ;;  %v2858_v21 = vpack.i.bf16 %v811_v35, %v794_v29  ;;  %vm972_vm2 = vcmp.lt.f32.partialorder %v964_v6, 0.0  ;;  %v966_v36 = vld [vmem:[%s3160_s3 + $0x18] sm:$0xff] }
 0x15b   :  { %2346 = vrot.lane.b32.xlu0 %v2851_v38, %s2570_s0  ;;  %v652_v43 = vcombine.low %v644_v32, %v651_v31  ;;  %v828_v44 = vcombine.low %v820_v37, %v827_v39  ;;  %vm971_vm3 = vcmp.lt.f32.partialorder %v963_v14, 0.0  ;;  %vm975_vm4 = vcmp.lt.f32.partialorder %v967_v18, 0.0 }
 0x15c   :  { %v845_v45 = vcombine.low %v837_v40, %v844_v42  ;;  %vm973_vm5 = vcmp.lt.f32.partialorder %v965_v19, 0.0  ;;  %vm976_vm6 = vcmp.lt.f32.partialorder %v968_v25, 0.0  ;;  %vm977_vm7 = vcmp.lt.f32.partialorder %v969_v34, 0.0 }
 0x15d   :  { %v2860_v46 = vpack.i.bf16 %v652_v43, %v635_v41  ;;  %vm974_vm8 = vcmp.lt.f32.partialorder %v966_v36, 0.0 }
 0x15e   :  { %v2864_v47 = vpack.i.bf16 %v845_v45, %v828_v44 }
 0x15f   :  { %2351 = vrot.lane.b32.xlu0 %v2858_v21, %s2570_s0  ;;  %2356 = vrot.lane.b32.xlu1 %v2860_v46, %s2570_s0 }
 0x163   :  { %2361 = vrot.lane.b32.xlu1 %v2864_v47, %s2570_s0 }
 0x1cd   :  { %v2347_v48 = vpop.permute.xlu0 %2346 }
 0x1ce   :  { %v2349_v22 = vunpack.i.h.bf16 %v2347_v48  ;;  %v2348_v49 = vunpack.i.l.bf16 %v2347_v48 }
 0x1d0   :  { %v2241_v52 = vpack.c.bf16 %v2349_v22, %v2348_v49 }
 0x1d1   :  { %v2352_v53 = vpop.permute.xlu0 %2351  ;;  %v2357_v54 = vpop.permute.xlu1 %2356 }
 0x1d2   :  { %v2354_v56 = vunpack.i.h.bf16 %v2352_v53  ;;  %v2353_v57 = vunpack.i.l.bf16 %v2352_v53  ;;  %2243 = vmatprep.subr.msk.bf16.mxu1 %vm2869_vm1, %v2241_v52  ;;  %v2359_v58 = vunpack.i.h.bf16 %v2357_v54  ;;  %v2358_v60 = vunpack.i.l.bf16 %v2357_v54 }
 0x1d3   :  { %2246 = vmatpush3.bf16.xpose.msk.msra.mxu1 %vm2869_vm1, %v2241_v52 }
 0x1d4   :  { %v2253_v61 = vpack.c.bf16 %v2354_v56, %v2353_v57  ;;  %v2247_v62 = vpack.c.bf16 %v2359_v58, %v2358_v60 }
 0x1d5   :  { %v2362_v0 = vpop.permute.xlu1 %2361 }
 0x1d6   :  { %2255 = vmatprep.subr.msk.bf16.mxu0 %vm2869_vm1, %v2253_v61  ;;  %v2364_v1 = vunpack.i.h.bf16 %v2362_v0  ;;  %v2363_v2 = vunpack.i.l.bf16 %v2362_v0  ;;  %2249 = vmatprep.subr.msk.bf16.mxu1 %vm2869_vm1, %v2247_v62 }
 0x1d7   :  { %2258 = vmatpush3.bf16.xpose.msk.msra.mxu0 %vm2869_vm1, %v2253_v61 }
 0x1d8   :  { %v2259_v3 = vpack.c.bf16 %v2364_v1, %v2363_v2 }
 0x1da   :  { %2261 = vmatprep.subr.msk.bf16.mxu0 %vm2869_vm1, %v2259_v3 }
 0x1db   :  { %2252 = vmatpush3.bf16.xpose.msk.msra.mxu1 %vm2869_vm1, %v2247_v62 }
 0x1df   :  { %2264 = vmatpush3.bf16.xpose.msk.msra.mxu0 %vm2869_vm1, %v2259_v3 }
 0x1e2   :  { %2118 = vmatmul.mubr.msk.f32.vlgmr.msra.gmra.mrb[0].mxu1 %vm119_vm0, %v618_v17 }
 0x1e3   :  { %2120 = vmatprep.mubr.msk.f32.mxu1 %vm119_vm0, %v635_v41 }
 0x1e6   :  { %2121 = vmatmul.mubr.msk.f32.gmra.mrb[2].mxu1 %vm119_vm0, %v652_v43  ;;  %2132 = vmatmul.mubr.msk.f32.vlgmr.msra.gmra.mrb[8].mxu0 %vm119_vm0, %v811_v35  ;;  %v970_v43 = vld [vmem:[%s3160_s3 + $0x38] sm:$0xff] }
 0x1e7   :  { %2134 = vmatprep.mubr.msk.f32.mxu0 %vm119_vm0, %v828_v44  ;;  %vm978_vm9 = vcmp.lt.f32.partialorder %v970_v43, 0.0 }
 0x1ea   :  { %2135 = vmatmul.mubr.msk.f32.gmra.mrb[10].mxu0 %vm119_vm0, %v845_v45 }
 0x2b5   :  { %v2119_v15 = vpop.f32.mrb[0].mxu1 }
 0x2b6   :  { %v956_v16 = vmul.f32 0.5, %v2119_v15  ;;  %v743_v55 = vpop.f32.mrb[1].mxu1 }
 0x2b7   :  { %v955_v63 = vmul.f32 0.5, %v743_v55 }
 0x2b8   :  { %v980_v20 = vsel %vm972_vm2, %v964_v6, %v956_v16 }
 0x2b9   :  { %v2122_v23 = vpop.f32.mrb[2].mxu1  ;;  %v2133_v50 = vpop.f32.mrb[8].mxu0  ;;  %v990_v59 = vsel %vm119_vm0, %v980_v20, -inf  ;;  %v979_v24 = vsel %vm971_vm3, %v963_v14, %v955_v63 }
 0x2ba   :  { %v936_v26 = vpop.f32.mrb[9].mxu0  ;;  %991 = vmax.xlane.f32.xlu1 %v990_v59  ;;  %v753_v27 = vpop.f32.mrb[3].mxu1  ;;  %v987_v28 = vsel %vm119_vm0, %v979_v24, -inf  ;;  %v960_v29 = vmul.f32 0.5, %v2133_v50  ;;  %v958_v39 = vmul.f32 0.5, %v2122_v23 }
 0x2bb   :  { %v959_v30 = vmul.f32 0.5, %v936_v26  ;;  %v957_v33 = vmul.f32 0.5, %v753_v27  ;;  %988 = vmax.xlane.f32.xlu0 %v987_v28 }
 0x2bc   :  { %v984_v41 = vsel %vm976_vm6, %v968_v25, %v960_v29  ;;  %v982_v22 = vsel %vm974_vm8, %v966_v36, %v958_v39 }
 0x2bd   :  { %v2136_v17 = vpop.f32.mrb[10].mxu0  ;;  %v983_v4 = vsel %vm975_vm4, %v967_v18, %v959_v30  ;;  %v2915_v35 = vsel %vm973_vm5, %v965_v19, %v957_v33  ;;  %v1002_v44 = vsel %vm119_vm0, %v984_v41, -inf  ;;  %v996_v49 = vsel %vm119_vm0, %v982_v22, -inf }
 0x2be   :  { %v946_v31 = vpop.f32.mrb[11].mxu0  ;;  %v999_v37 = vsel %vm119_vm0, %v983_v4, -inf  ;;  %v993_v32 = vsel %vm119_vm0, %v2915_v35, -inf  ;;  %v962_v48 = vmul.f32 0.5, %v2136_v17 }
 0x2bf   :  { %v961_v40 = vmul.f32 0.5, %v946_v31  ;;  %1000 = vmax.xlane.f32.xlu0 %v999_v37  ;;  %994 = vmax.xlane.f32.xlu1 %v993_v32 }
 0x2c0   :  { %v986_v51 = vsel %vm978_vm9, %v970_v43, %v962_v48 }
 0x2c1   :  { %v2923_v42 = vsel %vm977_vm7, %v969_v34, %v961_v40  ;;  %v1008_v52 = vsel %vm119_vm0, %v986_v51, -inf }
 0x2c2   :  { %v1005_v45 = vsel %vm119_vm0, %v2923_v42, -inf }
 0x2c3   :  { %1003 = vmax.xlane.f32.xlu0 %v1002_v44  ;;  %1006 = vmax.xlane.f32.xlu1 %v1005_v45 }
 0x2c7   :  { %997 = vmax.xlane.f32.xlu0 %v996_v49 }
 0x2cb   :  { %1009 = vmax.xlane.f32.xlu0 %v1008_v52 }
 0x2d4   :  { %2366 = vrot.lane.b32.xlu1 %v2851_v38, %s2571_s24 }
 0x347   :  { %v992_v53 = vpop.xlane.xlu1 %991 }
 0x348   :  { %v1012_v54 = vsub.f32 %v980_v20, %v992_v53  ;;  %v989_v56 = vpop.xlane.xlu0 %988 }
 0x349   :  { %v1011_v57 = vsub.f32 %v979_v24, %v989_v56 }
 0x34a   :  { %v1021_v58 = vmul.f32 1.442695, %v1012_v54 }
 0x34b   :  { %v1019_v60 = vmul.f32 1.442695, %v1011_v57 }
 0x34c   :  { %2385 = vpow2.f32 %v1021_v58  ;;  %v1001_v61 = vpop.xlane.xlu0 %1000  ;;  %v995_v62 = vpop.xlane.xlu1 %994 }
 0x34d   :  { %2387 = vpow2.f32 %v1019_v60  ;;  %v1015_v0 = vsub.f32 %v983_v4, %v1001_v61  ;;  %v1013_v36 = vsub.f32 %v2915_v35, %v995_v62 }
 0x34f   :  { %v1027_v1 = vmul.f32 1.442695, %v1015_v0  ;;  %v1023_v31 = vmul.f32 1.442695, %v1013_v36 }
 0x350   :  { %v1004_v2 = vpop.xlane.xlu0 %1003  ;;  %v1007_v3 = vpop.xlane.xlu1 %1006 }
 0x351   :  { %2389 = vpow2.f32 %v1027_v1  ;;  %v1016_v6 = vsub.f32 %v984_v41, %v1004_v2  ;;  %v1017_v37 = vsub.f32 %v2923_v42, %v1007_v3 }
 0x353   :  { %v1029_v14 = vmul.f32 1.442695, %v1016_v6  ;;  %v1031_v32 = vmul.f32 1.442695, %v1017_v37  ;;  %v1978_v37 = vld [vmem:[%s3162_s5] ss:$0 sm:$0xff] }
 0x354   :  { %v998_v15 = vpop.xlane.xlu0 %997  ;;  %v2367_v16 = vpop.permute.xlu1 %2366 }
 0x355   :  { %2391 = vpow2.f32 %v1029_v14  ;;  %v1014_v38 = vsub.f32 %v982_v22, %v998_v15  ;;  %v2369_v55 = vunpack.i.h.bf16 %v2367_v16  ;;  %v2368_v63 = vunpack.i.l.bf16 %v2367_v16 }
 0x356   :  { %v2386_v18 = vpop.eup %2385 }
 0x357   :  { %v2388_v19 = vpop.eup %2387  ;;  %v1025_v20 = vmul.f32 1.442695, %v1014_v38  ;;  %v2265_v23 = vpack.c.bf16 %v2369_v55, %v2368_v63  ;;  %v1038_v50 = vsel %vm119_vm0, %v2386_v18, 0.0 }
 0x358   :  { %1039 = vadd.xlane.f32.xlu0 %v1038_v50  ;;  %v1010_v59 = vpop.xlane.xlu0 %1009  ;;  %v1035_v24 = vsel %vm119_vm0, %v2388_v19, 0.0 }
 0x359   :  { %2393 = vpow2.f32 %v1025_v20  ;;  %v1018_v25 = vsub.f32 %v986_v51, %v1010_v59  ;;  %1036 = vadd.xlane.f32.xlu1 %v1035_v24  ;;  %2266 = vmatprep.subr.bf16.mxu1 %v2265_v23  ;;  %v1293_v59 = vld [vmem:[#allocation5] sm:$0xff]  ;;  %v1294_v24 = vld [vmem:[#allocation5 + $0x8] sm:$0xff] }
 0x35a   :  { %2268 = vmatpush3.bf16.msra.mxu1 %v2265_v23 }
 0x35b   :  { %v2390_v26 = vpop.eup %2389  ;;  %v1033_v27 = vmul.f32 1.442695, %v1018_v25  ;;  %v2281_v25 = vpack.c.bf16 %v1294_v24, %v1293_v59 }
 0x35c   :  { %v1047_v28 = vsel %vm119_vm0, %v2390_v26, 0.0 }
 0x35d   :  { %2395 = vpow2.f32 %v1033_v27  ;;  %1048 = vadd.xlane.f32.xlu1 %v1047_v28  ;;  %v1296_v27 = vld [vmem:[#allocation5 + $0x18] sm:$0xff] }
 0x35e   :  { %2397 = vpow2.f32 %v1023_v31 }
 0x35f   :  { %v2938_v29 = vpop.eup %2391  ;;  %2399 = vpow2.f32 %v1031_v32 }
 0x360   :  { %v1050_v30 = vsel %vm119_vm0, %v2938_v29, 0.0 }
 0x361   :  { %1051 = vadd.xlane.f32.xlu0 %v1050_v30 }
 0x363   :  { %v2942_v33 = vpop.eup %2393 }
 0x364   :  { %v1044_v34 = vsel %vm119_vm0, %v2942_v33, 0.0 }
 0x365   :  { %1045 = vadd.xlane.f32.xlu0 %v1044_v34 }
 0x367   :  { %v2946_v17 = vpop.eup %2395 }
 0x368   :  { %v1056_v4 = vsel %vm119_vm0, %v2946_v17, 0.0  ;;  %v2398_v39 = vpop.eup %2397 }
 0x369   :  { %1057 = vadd.xlane.f32.xlu0 %v1056_v4  ;;  %v1041_v40 = vsel %vm119_vm0, %v2398_v39, 0.0  ;;  %v2400_v41 = vpop.eup %2399 }
 0x36a   :  { %v1053_v43 = vsel %vm119_vm0, %v2400_v41, 0.0 }
 0x36e   :  { %2376 = vrot.lane.b32.xlu1 %v2860_v46, %s2571_s24 }
 0x37f   :  { %2371 = vrot.lane.b32.xlu0 %v2858_v21, %s2571_s24 }
 0x392   :  { %1042 = vadd.xlane.f32.xlu1 %v1041_v40 }
 0x396   :  { %1054 = vadd.xlane.f32.xlu1 %v1053_v43 }
 0x3a7   :  { %2381 = vrot.lane.b32.xlu1 %v2864_v47, %s2571_s24 }
 0x3e5   :  { %v1040_v46 = vpop.xlane.xlu0 %1039 }
 0x3e6   :  { %v1037_v35 = vpop.xlane.xlu1 %1036 }
 0x3e7   :  { %2401 = vrcp.f32 %v1037_v35 }
 0x3e8   :  { %2403 = vrcp.f32 %v1040_v46 }
 0x3ea   :  { %v1049_v21 = vpop.xlane.xlu1 %1048 }
 0x3eb   :  { %2405 = vrcp.f32 %v1049_v21 }
 0x3ee   :  { %v1052_v42 = vpop.xlane.xlu0 %1051  ;;  %v2377_v44 = vpop.permute.xlu1 %2376 }
 0x3ef   :  { %v2379_v45 = vunpack.i.h.bf16 %v2377_v44  ;;  %v2378_v48 = vunpack.i.l.bf16 %v2377_v44 }
 0x3f1   :  { %v2402_v22 = vpop.eup %2401  ;;  %v2269_v49 = vpack.c.bf16 %v2379_v45, %v2378_v48 }
 0x3f2   :  { %v2404_v51 = vpop.eup %2403  ;;  %v1046_v52 = vpop.xlane.xlu0 %1045  ;;  %v1060_v53 = vmul.f32 %v2402_v22, %v2388_v19 }
 0x3f3   :  { %2270 = vmatprep.subr.bf16.mxu1 %v2269_v49  ;;  %v1062_v54 = vmul.f32 %v2404_v51, %v2386_v18  ;;  %2407 = vrcp.f32 %v1046_v52 }
 0x3f4   :  { %2272 = vmatpush3.bf16.msra.mxu1 %v2269_v49  ;;  %2145 = vmatprep.mubr.msk.f32.mxu1 %vm119_vm0, %v1060_v53 }
 0x3f5   :  { %v2406_v47 = vpop.eup %2405  ;;  %2282 = vmatprep.subr.bf16.mxu1 %v2281_v25 }
 0x3f6   :  { %v1058_v56 = vpop.xlane.xlu0 %1057  ;;  %v1068_v57 = vmul.f32 %v2406_v47, %v2390_v26  ;;  %v1295_v26 = vld [vmem:[#allocation5 + $0x10] sm:$0xff] }
 0x3f7   :  { %2146 = vmatmul.mubr.msk.f32.vlgmr.msra.gmra.mrb[4].mxu1 %vm119_vm0, %v1062_v54  ;;  %v2285_v28 = vpack.c.bf16 %v1296_v27, %v1295_v26 }
 0x3f8   :  { %2159 = vmatprep.mubr.msk.f32.mxu0 %vm119_vm0, %v1068_v57  ;;  %2284 = vmatpush3.bf16.msra.mxu1 %v2281_v25 }
 0x3f9   :  { %2286 = vmatprep.subr.bf16.mxu1 %v2285_v28 }
 0x3fa   :  { %v2372_v58 = vpop.permute.xlu0 %2371 }
 0x3fb   :  { %v2374_v60 = vunpack.i.h.bf16 %v2372_v58  ;;  %v2373_v61 = vunpack.i.l.bf16 %v2372_v58 }
 0x3fc   :  { %2288 = vmatpush3.bf16.msra.mxu1 %v2285_v28 }
 0x3fd   :  { %v2273_v62 = vpack.c.bf16 %v2374_v60, %v2373_v61  ;;  %v2408_v14 = vpop.eup %2407 }
 0x3fe   :  { %v1066_v63 = vmul.f32 %v2408_v14, %v2942_v33 }
 0x3ff   :  { %2274 = vmatprep.subr.bf16.mxu0 %v2273_v62 }
 0x400   :  { %2276 = vmatpush3.bf16.msra.mxu0 %v2273_v62 }
 0x41f   :  { %v1043_v0 = vpop.xlane.xlu1 %1042 }
 0x420   :  { %2409 = vrcp.f32 %v1043_v0 }
 0x421   :  { %2411 = vrcp.f32 %v1052_v42 }
 0x423   :  { %v1055_v1 = vpop.xlane.xlu1 %1054 }
 0x424   :  { %2413 = vrcp.f32 %v1055_v1 }
 0x425   :  { %2415 = vrcp.f32 %v1058_v56 }
 0x427   :  { %v2382_v2 = vpop.permute.xlu1 %2381 }
 0x428   :  { %v2384_v3 = vunpack.i.h.bf16 %v2382_v2  ;;  %v2383_v6 = vunpack.i.l.bf16 %v2382_v2 }
 0x42a   :  { %v2410_v15 = vpop.eup %2409  ;;  %v2277_v16 = vpack.c.bf16 %v2384_v3, %v2383_v6 }
 0x42b   :  { %v2412_v38 = vpop.eup %2411  ;;  %v1064_v55 = vmul.f32 %v2410_v15, %v2398_v39 }
 0x42c   :  { %2278 = vmatprep.subr.bf16.mxu0 %v2277_v16  ;;  %v1070_v19 = vmul.f32 %v2412_v38, %v2938_v29 }
 0x42d   :  { %2148 = vmatprep.mubr.msk.f32.mxu1 %vm119_vm0, %v1064_v55  ;;  %2280 = vmatpush3.bf16.msra.mxu0 %v2277_v16 }
 0x42e   :  { %v2414_v18 = vpop.eup %2413  ;;  %2149 = vmatmul.mubr.msk.f32.gmra.mrb[6].mxu1 %vm119_vm0, %v1066_v63 }
 0x42f   :  { %v2416_v20 = vpop.eup %2415  ;;  %v1072_v23 = vmul.f32 %v2414_v18, %v2400_v41 }
 0x430   :  { %2160 = vmatmul.mubr.msk.f32.vlgmr.msra.gmra.mrb[12].mxu0 %vm119_vm0, %v1070_v19  ;;  %v1074_v50 = vmul.f32 %v2416_v20, %v2946_v17 }
 0x431   :  { %2162 = vmatprep.mubr.msk.f32.mxu0 %vm119_vm0, %v1072_v23 }
 0x434   :  { %2163 = vmatmul.mubr.msk.f32.gmra.mrb[14].mxu0 %vm119_vm0, %v1074_v50 }
 0x4ca   :  { %v2147_v29 = vpop.f32.mrb[4].mxu1 }
 0x4cb   :  { %v1165_v30 = vpop.f32.mrb[5].mxu1 }
 0x4cc   :  { %2173 = vmatprep.mubr.msk.f32.mxu1 %vm119_vm0, %v1165_v30 }
 0x501   :  { %v2150_v33 = vpop.f32.mrb[6].mxu1 }
 0x502   :  { %v1175_v34 = vpop.f32.mrb[7].mxu1 }
 0x503   :  { %v2161_v4 = vpop.f32.mrb[12].mxu0 }
 0x504   :  { %v1274_v17 = vpop.f32.mrb[13].mxu0 }
 0x505   :  { %2174 = vmatmul.mubr.msk.f32.vlgmr.msra.gmra.mrb[8].mxu1 %vm119_vm0, %v1274_v17 }
 0x506   :  { %2176 = vmatprep.mubr.msk.f32.mxu1 %vm119_vm0, %v2147_v29 }
 0x507   :  { %v2164_v36 = vpop.f32.mrb[14].mxu0 }
 0x508   :  { %v1284_v31 = vpop.f32.mrb[15].mxu0 }
 0x509   :  { %2177 = vmatmul.mubr.msk.f32.gmra.mrb[10].mxu1 %vm119_vm0, %v2161_v4 }
 0x50a   :  { %2179 = vmatprep.mubr.msk.f32.mxu1 %vm119_vm0, %v1175_v34 }
 0x50d   :  { %2180 = vmatmul.mubr.msk.f32.gmra.mrb[12].mxu1 %vm119_vm0, %v1284_v31 }
 0x50e   :  { %2182 = vmatprep.mubr.msk.f32.mxu1 %vm119_vm0, %v2150_v33 }
 0x511   :  { %2183 = vmatmul.mubr.msk.f32.gmra.mrb[14].mxu1 %vm119_vm0, %v2164_v36 }
 0x5d8   :  { %v2175_v32 = vpop.f32.mrb[8].mxu1 }
 0x5d9   :  { %v1400_v39 = vadd.f32 %v2175_v32, %v1978_v37  ;;  %v1394_v40 = vpop.f32.mrb[9].mxu1 }
 0x5da   :  { %v1395_v41 = vadd.f32 %v1978_v37, %v1394_v40 }
 0x5db   :  { %v1434_v43 = vadd.f32 %v1400_v39, %v2722_v7 }
 0x5dc   :  { %v1433_v46 = vadd.f32 %v1395_v41, %v2715_v5  ;;  %v2178_v35 = vpop.f32.mrb[10].mxu1 }
 0x5dd   :  { %v1410_v21 = vadd.f32 %v2178_v35, %v1978_v37  ;;  %v1404_v42 = vpop.f32.mrb[11].mxu1  ;;  %v1442_v44 = vsel %vm119_vm0, %v1434_v43, 0.0 }
 0x5de   :  { %v1441_v45 = vsel %vm119_vm0, %v1433_v46, 0.0  ;;  %v1405_v48 = vadd.f32 %v1978_v37, %v1404_v42 }
 0x5df   :  { %v1436_v22 = vadd.f32 %v1410_v21, %v2736_v9  ;;  %v1443_v52 = vadd.f32 %v1442_v44, %v1441_v45 }
 0x5e0   :  { %v1435_v49 = vadd.f32 %v1405_v48, %v2727_v8  ;;  %v2181_v51 = vpop.f32.mrb[12].mxu1 }
 0x5e1   :  { %v1420_v53 = vadd.f32 %v2181_v51, %v1978_v37  ;;  %v1414_v47 = vpop.f32.mrb[13].mxu1  ;;  %v1446_v56 = vsel %vm119_vm0, %v1436_v22, 0.0  ;;  %v1525_v51 = vld [vmem:[#allocation7] sm:$0xff] }
 0x5e2   :  { %v1444_v7 = vsel %vm119_vm0, %v1435_v49, 0.0  ;;  %v1415_v54 = vadd.f32 %v1978_v37, %v1414_v47 }
 0x5e3   :  { %v1445_v5 = vadd.f32 %v1444_v7, %v1443_v52  ;;  %v1438_v57 = vadd.f32 %v1420_v53, %v2750_v11  ;;  %v1526_v52 = vld [vmem:[#allocation7 + $0x8] sm:$0xff] }
 0x5e4   :  { %v1437_v58 = vadd.f32 %v1415_v54, %v2741_v10  ;;  %v2184_v60 = vpop.f32.mrb[14].mxu1  ;;  %v2289_v53 = vpack.c.bf16 %v1526_v52, %v1525_v51  ;;  %v1527_v54 = vld [vmem:[#allocation7 + $0x10] sm:$0xff] }
 0x5e5   :  { %v1447_v61 = vadd.f32 %v1446_v56, %v1445_v5  ;;  %v1430_v62 = vadd.f32 %v2184_v60, %v1978_v37  ;;  %v1424_v9 = vpop.f32.mrb[15].mxu1  ;;  %v1450_v2 = vsel %vm119_vm0, %v1438_v57, 0.0  ;;  %v1528_v5 = vld [vmem:[#allocation7 + $0x18] sm:$0xff] }
 0x5e6   :  { %v1448_v8 = vsel %vm119_vm0, %v1437_v58, 0.0  ;;  %v1425_v0 = vadd.f32 %v1978_v37, %v1424_v9  ;;  %2290 = vmatprep.subr.bf16.mxu0 %v2289_v53  ;;  %v1673_v9 = vld [vmem:[%s3165_s8] sm:$0xff] }
 0x5e7   :  { %v1449_v1 = vadd.f32 %v1448_v8, %v1447_v61  ;;  %v1440_v3 = vadd.f32 %v1430_v62, %v2764_v13  ;;  %2292 = vmatpush3.bf16.msra.mxu0 %v2289_v53  ;;  %v1674_v8 = vld [vmem:[%s3165_s8 + $0x8] sm:$0xff] }
 0x5e8   :  { %v1439_v6 = vadd.f32 %v1425_v0, %v2755_v12  ;;  %v1675_v0 = vld [vmem:[%s3165_s8 + $0x10] sm:$0xff] }
 0x5e9   :  { %v1451_v14 = vadd.f32 %v1450_v2, %v1449_v1  ;;  %v1454_v10 = vsel %vm119_vm0, %v1440_v3, 0.0  ;;  %v2297_v1 = vpack.c.bf16 %v1674_v8, %v1673_v9  ;;  %v1676_v2 = vld [vmem:[%s3165_s8 + $0x18] sm:$0xff] }
 0x5ea   :  { %v1452_v15 = vsel %vm119_vm0, %v1439_v6, 0.0 }
 0x5eb   :  { %v1453_v11 = vadd.f32 %v1452_v15, %v1451_v14  ;;  %2313 = vmatprep.subr.bf16.mxu1 %v2297_v1  ;;  %v1678_v14 = vld [vmem:[%s3165_s8 + $0x28] sm:$0xff] }
 0x5ec   :  { %2317 = vmatpush3.bf16.msra.mxu1 %v2297_v1 }
 0x5ed   :  { %v1455_v16 = vadd.f32 %v1454_v10, %v1453_v11 }
 0x5ef   :  { %1456 = vadd.xlane.f32.xlu0 %v1455_v16 }
 0x67c   :  { %v1457_v38 = vpop.xlane.xlu0 %1456 }
 0x67d   :  { %v1458_v55 = vrot.slane %v1457_v38, 4 }
 0x67f   :  { %v1459_v63 = vadd.f32 %v1458_v55, %v1457_v38 }
 0x681   :  { %v1460_v18 = vrot.slane %v1459_v63, 2 }
 0x683   :  { %v1461_v19 = vadd.f32 %v1460_v18, %v1459_v63 }
 0x685   :  { %v1462_v20 = vrot.slane %v1461_v19, 1 }
 0x687   :  { %v1463_v23 = vadd.f32 %v1462_v20, %v1461_v19 }
 0x689   :  { %2321 = vpush %v1463_v23 }
 0x6ba   :  { %s2322_s5 = spop %2321 }
 0x6bb   :  { %s1467_s28 = smul.f32 0.00048828125, %s2322_s5  ;;  %s2572_s5 = smov [#allocation11]  }
 0x6bd   :  { %v1468_v13 = vstv %s1467_s28  ;;  %s1923_s28 = sshll.u32 %s2572_s5, 4  ;;  %s1924_s28 = int_to_ptr.vmem [resolvable:$true] %s1923_s28 }
 0x6be   :  { %v2998_v12 = vsub.f32 %v1433_v46, %v1468_v13  ;;  %v3000_v50 = vsub.f32 %v1434_v43, %v1468_v13  ;;  %v3002_v59 = vsub.f32 %v1435_v49, %v1468_v13  ;;  %v3004_v24 = vsub.f32 %v1436_v22, %v1468_v13  ;;  %s2531_s29 = scalar_lea.vmem %s1924_s28, 1024  ;;  %p2536_p13 = scmp.lt.s32.totalorder %s1924_s28, %s1924_s28 }
 0x6bf   :  { %v3006_v25 = vsub.f32 %v1437_v58, %v1468_v13  ;;  %v3014_v29 = vsub.f32 %v1438_v57, %v1468_v13  ;;  %v3020_v17 = vsub.f32 %v1439_v6, %v1468_v13  ;;  %v3025_v32 = vsub.f32 %v1440_v3, %v1468_v13  ;;  %v1677_v6 = vld [vmem:[%s3165_s8 + $0x20] sm:$0xff]  ;;  %p2532_p12 = scmp.ne.s32.totalorder %s1924_s28, %s2531_s29  ;;  %p2537_p0 = scmp.lt.s32.totalorder %s2531_s29, %s2531_s29 }
 0x6c0   :  { %v1477_v26 = vmul.f32 %v2998_v12, %v2998_v12  ;;  %v1478_v27 = vmul.f32 %v3000_v50, %v3000_v50  ;;  %v1479_v28 = vmul.f32 %v3002_v59, %v3002_v59  ;;  %v1480_v30 = vmul.f32 %v3004_v24, %v3004_v24 }
 0x6c1   :  { %v1481_v36 = vmul.f32 %v3006_v25, %v3006_v25  ;;  %v1482_v39 = vmul.f32 %v3014_v29, %v3014_v29  ;;  %v1483_v43 = vmul.f32 %v3020_v17, %v3020_v17  ;;  %v1484_v21 = vmul.f32 %v3025_v32, %v3025_v32  ;;  %p2538_p1 = por %p2537_p0, %p2536_p13 }
 0x6c2   :  { %v1485_v33 = vsel %vm119_vm0, %v1477_v26, 0.0  ;;  %v1486_v34 = vsel %vm119_vm0, %v1478_v27, 0.0  ;;  %v1488_v31 = vsel %vm119_vm0, %v1479_v28, 0.0  ;;  %v1490_v40 = vsel %vm119_vm0, %v1480_v30, 0.0 }
 0x6c3   :  { %v1487_v4 = vadd.f32 %v1486_v34, %v1485_v33  ;;  %v1492_v46 = vsel %vm119_vm0, %v1481_v36, 0.0  ;;  %v1494_v42 = vsel %vm119_vm0, %v1482_v39, 0.0  ;;  %v1496_v45 = vsel %vm119_vm0, %v1483_v43, 0.0  ;;  %p2539_p2 = pnand %p2538_p1, %p2532_p12 }
 0x6c4   :  { %v1498_v22 = vsel %vm119_vm0, %v1484_v21, 0.0  ;;  %v2293_v57 = vpack.c.bf16 %v1528_v5, %v1527_v54  ;;  %v2301_v3 = vpack.c.bf16 %v1676_v2, %v1675_v0  ;;  %v2305_v15 = vpack.c.bf16 %v1678_v14, %v1677_v6 }
 0x6c5   :  { %v1489_v37 = vadd.f32 %v1488_v31, %v1487_v4 }
 0x6c6   :  { %2294 = vmatprep.subr.bf16.mxu0 %v2293_v57  ;;  %2314 = vmatprep.subr.bf16.mxu1 %v2301_v3 }
 0x6c7   :  { %v1491_v41 = vadd.f32 %v1490_v40, %v1489_v37  ;;  %2296 = vmatpush3.bf16.msra.mxu0 %v2293_v57  ;;  %2318 = vmatpush3.bf16.msra.mxu1 %v2301_v3 }
 0x6c8   :  { %2298 = vmatprep.subr.bf16.mxu0 %v2297_v1  ;;  %2315 = vmatprep.subr.bf16.mxu1 %v2305_v15 }
 0x6c9   :  { %v1493_v35 = vadd.f32 %v1492_v46, %v1491_v41 }
 0x6cb   :  { %v1495_v44 = vadd.f32 %v1494_v42, %v1493_v35  ;;  %2319 = vmatpush3.bf16.msra.mxu1 %v2305_v15 }
 0x6cd   :  { %v1497_v48 = vadd.f32 %v1496_v45, %v1495_v44 }
 0x6cf   :  { %v1499_v49 = vadd.f32 %v1498_v22, %v1497_v48  ;;  %v1996_v48 = vld [vmem:[#allocation10] ss:$0 sm:$0xff] }
 0x6d1   :  { %1500 = vadd.xlane.f32.xlu1 %v1499_v49 }
 0x75e   :  { %v1501_v47 = vpop.xlane.xlu1 %1500 }
 0x75f   :  { %v1502_v7 = vrot.slane %v1501_v47, 4 }
 0x761   :  { %v1503_v56 = vadd.f32 %v1502_v7, %v1501_v47 }
 0x763   :  { %v1504_v58 = vrot.slane %v1503_v56, 2 }
 0x765   :  { %v1505_v60 = vadd.f32 %v1504_v58, %v1503_v56 }
 0x767   :  { %v1506_v61 = vrot.slane %v1505_v60, 1 }
 0x769   :  { %v1507_v62 = vadd.f32 %v1506_v61, %v1505_v60 }
 0x76b   :  { %2323 = vpush %v1507_v62 }
 0x79c   :  { %s2324_s17 = spop %2323 }
 0x79d   :  { %s1511_s18 = smul.f32 0.00048828125, %s2324_s17 }
 0x79f   :  { %s1512_s9 = sadd.f32 1e-05, %s1511_s18 }
 0x7a1   :  { %v1513_v11 = vstv %s1512_s9 }
 0x7a2   :  { %2417 = vrsqrt.f32 %v1513_v11 }
 0x7ac   :  { %v2418_v10 = vpop.eup %2417 }
 0x7ad   :  { %2325 = vpush %v2418_v10 }
 0x7de   :  { %s2326_s4 = spop %2325 }
 0x7df   :  { %v1516_v16 = vstv %s2326_s4 }
 0x7e0   :  { %v3057_v38 = vmul.f32 %v1516_v16, %v3000_v50  ;;  %v3060_v55 = vmul.f32 %v1516_v16, %v2998_v12  ;;  %v3065_v63 = vmul.f32 %v1516_v16, %v3002_v59  ;;  %v3072_v18 = vmul.f32 %v1516_v16, %v3004_v24  ;;  %v1679_v12 = vld [vmem:[%s3165_s8 + $0x30] sm:$0xff]  ;;  %v1680_v50 = vld [vmem:[%s3165_s8 + $0x38] sm:$0xff]  ;;  %v1987_v24 = vld [vmem:[#allocation8] ss:$0 sm:$0xff] }
 0x7e1   :  { %v3075_v19 = vmul.f32 %v1516_v16, %v3006_v25  ;;  %v3082_v20 = vmul.f32 %v1516_v16, %v3014_v29  ;;  %v3085_v23 = vmul.f32 %v1516_v16, %v3020_v17  ;;  %v3092_v13 = vmul.f32 %v1516_v16, %v3025_v32 }
 0x7e2   :  { %2193 = vmatprep.mubr.msk.f32.mxu0 %vm119_vm0, %v3060_v55  ;;  %v2309_v59 = vpack.c.bf16 %v1680_v50, %v1679_v12 }
 0x7e3   :  { %2194 = vmatmul.mubr.msk.f32.vlgmr.msra.gmra.mrb[16].mxu0 %vm119_vm0, %v3057_v38 }
 0x7e4   :  { %2196 = vmatprep.mubr.msk.f32.mxu0 %vm119_vm0, %v3065_v63  ;;  %2300 = vmatpush3.bf16.msra.mxu0 %v2297_v1 }
 0x7e5   :  { %2302 = vmatprep.subr.bf16.mxu0 %v2301_v3  ;;  %2316 = vmatprep.subr.bf16.mxu1 %v2309_v59 }
 0x7e6   :  { %2320 = vmatpush3.bf16.msra.mxu1 %v2309_v59 }
 0x7e7   :  { %2197 = vmatmul.mubr.msk.f32.gmra.mrb[18].mxu0 %vm119_vm0, %v3072_v18 }
 0x7e8   :  { %2199 = vmatprep.mubr.msk.f32.mxu0 %vm119_vm0, %v3075_v19  ;;  %2304 = vmatpush3.bf16.msra.mxu0 %v2301_v3 }
 0x7e9   :  { %2306 = vmatprep.subr.bf16.mxu0 %v2305_v15 }
 0x7eb   :  { %2200 = vmatmul.mubr.msk.f32.gmra.mrb[20].mxu0 %vm119_vm0, %v3082_v20 }
 0x7ec   :  { %2202 = vmatprep.mubr.msk.f32.mxu0 %vm119_vm0, %v3085_v23  ;;  %2308 = vmatpush3.bf16.msra.mxu0 %v2305_v15 }
 0x7ed   :  { %2310 = vmatprep.subr.bf16.mxu0 %v2309_v59 }
 0x7ef   :  { %2203 = vmatmul.mubr.msk.f32.gmra.mrb[22].mxu0 %vm119_vm0, %v3092_v13 }
 0x7f0   :  { %2312 = vmatpush3.bf16.msra.mxu0 %v2309_v59 }
 0x8b6   :  { %v2195_v25 = vpop.f32.mrb[16].mxu0 }
 0x8b7   :  { %v1632_v26 = vadd.f32 %v2195_v25, %v1987_v24  ;;  %v1626_v27 = vpop.f32.mrb[17].mxu0 }
 0x8b8   :  { %v1627_v28 = vadd.f32 %v1987_v24, %v1626_v27 }
 0x8b9   :  { %v1666_v33 = vmax.f32 %v1632_v26, 0.0 }
 0x8ba   :  { %v1665_v29 = vmax.f32 %v1627_v28, 0.0  ;;  %v2198_v30 = vpop.f32.mrb[18].mxu0 }
 0x8bb   :  { %v1642_v34 = vadd.f32 %v2198_v30, %v1987_v24  ;;  %v1636_v4 = vpop.f32.mrb[19].mxu0 }
 0x8bc   :  { %v1637_v17 = vadd.f32 %v1987_v24, %v1636_v4  ;;  %2221 = vmatprep.mubr.msk.f32.mxu0 %vm1688_vm10, %v1665_v29 }
 0x8bd   :  { %2222 = vmatmul.mubr.msk.f32.vlgmr.msra.gmra.mrb[24].mxu0 %vm1688_vm10, %v1666_v33  ;;  %v1668_v37 = vmax.f32 %v1642_v34, 0.0 }
 0x8be   :  { %v1667_v36 = vmax.f32 %v1637_v17, 0.0  ;;  %v2201_v31 = vpop.f32.mrb[20].mxu0 }
 0x8bf   :  { %v1652_v32 = vadd.f32 %v2201_v31, %v1987_v24  ;;  %v1646_v39 = vpop.f32.mrb[21].mxu0 }
 0x8c0   :  { %v1647_v40 = vadd.f32 %v1987_v24, %v1646_v39  ;;  %2224 = vmatprep.mubr.msk.f32.mxu1 %vm1688_vm10, %v1667_v36 }
 0x8c1   :  { %2225 = vmatmul.mubr.msk.f32.vlgmr.msra.gmra.mrb[16].mxu1 %vm1688_vm10, %v1668_v37  ;;  %v1670_v46 = vmax.f32 %v1652_v32, 0.0 }
 0x8c2   :  { %v1669_v41 = vmax.f32 %v1647_v40, 0.0  ;;  %v2204_v43 = vpop.f32.mrb[22].mxu0 }
 0x8c3   :  { %v1662_v35 = vadd.f32 %v2204_v43, %v1987_v24  ;;  %v1656_v21 = vpop.f32.mrb[23].mxu0 }
 0x8c4   :  { %v1657_v42 = vadd.f32 %v1987_v24, %v1656_v21  ;;  %2227 = vmatprep.mubr.msk.f32.mxu1 %vm1688_vm10, %v1669_v41 }
 0x8c5   :  { %2228 = vmatmul.mubr.msk.f32.gmra.mrb[18].mxu1 %vm1688_vm10, %v1670_v46  ;;  %v1672_v45 = vmax.f32 %v1662_v35, 0.0 }
 0x8c6   :  { %v1671_v44 = vmax.f32 %v1657_v42, 0.0 }
 0x8c8   :  { %2230 = vmatprep.mubr.msk.f32.mxu1 %vm1688_vm10, %v1671_v44 }
 0x8c9   :  { %2231 = vmatmul.mubr.msk.f32.gmra.mrb[20].mxu1 %vm1688_vm10, %v1672_v45 }
 0x990   :  { %v2223_v22 = vpop.f32.mrb[24].mxu0 }
 0x991   :  { %v1785_v49 = vadd.f32 %v2223_v22, %v1996_v48  ;;  %v1779_v51 = vpop.f32.mrb[25].mxu0 }
 0x992   :  { %v1780_v52 = vadd.f32 %v1996_v48, %v1779_v51 }
 0x993   :  { %v1819_v53 = vadd.f32 %v1785_v49, %v3057_v38 }
 0x994   :  { %v1818_v47 = vadd.f32 %v1780_v52, %v3060_v55  ;;  %v2226_v7 = vpop.f32.mrb[16].mxu1 }
 0x995   :  { %v1795_v54 = vadd.f32 %v2226_v7, %v1996_v48  ;;  %v1789_v5 = vpop.f32.mrb[17].mxu1  ;;  %v1827_v56 = vsel %vm119_vm0, %v1819_v53, 0.0 }
 0x996   :  { %v1826_v57 = vsel %vm119_vm0, %v1818_v47, 0.0  ;;  %v1790_v58 = vadd.f32 %v1996_v48, %v1789_v5 }
 0x997   :  { %v1821_v60 = vadd.f32 %v1795_v54, %v3072_v18  ;;  %v1828_v9 = vadd.f32 %v1827_v56, %v1826_v57 }
 0x998   :  { %v1820_v61 = vadd.f32 %v1790_v58, %v3065_v63  ;;  %v2229_v62 = vpop.f32.mrb[18].mxu1 }
 0x999   :  { %v1805_v8 = vadd.f32 %v2229_v62, %v1996_v48  ;;  %v1799_v0 = vpop.f32.mrb[19].mxu1  ;;  %v1831_v6 = vsel %vm119_vm0, %v1821_v60, 0.0 }
 0x99a   :  { %v1829_v1 = vsel %vm119_vm0, %v1820_v61, 0.0  ;;  %v1800_v2 = vadd.f32 %v1996_v48, %v1799_v0 }
 0x99b   :  { %v1830_v3 = vadd.f32 %v1829_v1, %v1828_v9  ;;  %v1823_v14 = vadd.f32 %v1805_v8, %v3082_v20 }
 0x99c   :  { %v1822_v15 = vadd.f32 %v1800_v2, %v3075_v19  ;;  %v2232_v11 = vpop.f32.mrb[20].mxu1 }
 0x99d   :  { %v1832_v10 = vadd.f32 %v1831_v6, %v1830_v3  ;;  %v1815_v16 = vadd.f32 %v2232_v11, %v1996_v48  ;;  %v1809_v38 = vpop.f32.mrb[21].mxu1  ;;  %v1835_v12 = vsel %vm119_vm0, %v1823_v14, 0.0 }
 0x99e   :  { %v1833_v55 = vsel %vm119_vm0, %v1822_v15, 0.0  ;;  %v1810_v63 = vadd.f32 %v1996_v48, %v1809_v38 }
 0x99f   :  { %v1834_v18 = vadd.f32 %v1833_v55, %v1832_v10  ;;  %v1825_v50 = vadd.f32 %v1815_v16, %v3092_v13 }
 0x9a0   :  { %v1824_v59 = vadd.f32 %v1810_v63, %v3085_v23 }
 0x9a1   :  { %v1836_v24 = vadd.f32 %v1835_v12, %v1834_v18  ;;  %v1839_v19 = vsel %vm119_vm0, %v1825_v50, 0.0 }
 0x9a2   :  { %v1837_v25 = vsel %vm119_vm0, %v1824_v59, 0.0 }
 0x9a3   :  { %v1838_v20 = vadd.f32 %v1837_v25, %v1836_v24 }
 0x9a5   :  { %v1840_v26 = vadd.f32 %v1839_v19, %v1838_v20 }
 0x9a7   :  { %1841 = vadd.xlane.f32.xlu0 %v1840_v26 }
 0xa34   :  { %v1842_v27 = vpop.xlane.xlu0 %1841 }
 0xa35   :  { %v1843_v28 = vrot.slane %v1842_v27, 4 }
 0xa37   :  { %v1844_v29 = vadd.f32 %v1843_v28, %v1842_v27 }
 0xa39   :  { %v1845_v30 = vrot.slane %v1844_v29, 2 }
 0xa3b   :  { %v1846_v33 = vadd.f32 %v1845_v30, %v1844_v29 }
 0xa3d   :  { %v1847_v34 = vrot.slane %v1846_v33, 1 }
 0xa3f   :  { %v1848_v4 = vadd.f32 %v1847_v34, %v1846_v33 }
 0xa41   :  { %2327 = vpush %v1848_v4 }
 0xa72   :  { %s2328_s8 = spop %2327 }
 0xa73   :  { %s1852_s1 = smul.f32 0.00048828125, %s2328_s8 }
 0xa75   :  { %v1853_v13 = vstv %s1852_s1 }
 0xa76   :  { %v1854_v23 = vsub.f32 %v1818_v47, %v1853_v13  ;;  %v1855_v17 = vsub.f32 %v1819_v53, %v1853_v13  ;;  %v1856_v36 = vsub.f32 %v1820_v61, %v1853_v13  ;;  %v1857_v31 = vsub.f32 %v1821_v60, %v1853_v13 }
 0xa77   :  { %v1858_v37 = vsub.f32 %v1822_v15, %v1853_v13  ;;  %v1859_v41 = vsub.f32 %v1823_v14, %v1853_v13  ;;  %v1860_v42 = vsub.f32 %v1824_v59, %v1853_v13  ;;  %v1861_v22 = vsub.f32 %v1825_v50, %v1853_v13 }
 0xa78   :  { %v1862_v32 = vmul.f32 %v1854_v23, %v1854_v23  ;;  %v1863_v39 = vmul.f32 %v1855_v17, %v1855_v17  ;;  %v1864_v40 = vmul.f32 %v1856_v36, %v1856_v36  ;;  %v1865_v43 = vmul.f32 %v1857_v31, %v1857_v31 }
 0xa79   :  { %v1866_v44 = vmul.f32 %v1858_v37, %v1858_v37  ;;  %v1867_v49 = vmul.f32 %v1859_v41, %v1859_v41  ;;  %v1868_v53 = vmul.f32 %v1860_v42, %v1860_v42  ;;  %v1869_v54 = vmul.f32 %v1861_v22, %v1861_v22 }
 0xa7a   :  { %v1870_v46 = vsel %vm119_vm0, %v1862_v32, 0.0  ;;  %v1871_v35 = vsel %vm119_vm0, %v1863_v39, 0.0  ;;  %v1873_v45 = vsel %vm119_vm0, %v1864_v40, 0.0  ;;  %v1875_v51 = vsel %vm119_vm0, %v1865_v43, 0.0 }
 0xa7b   :  { %v1872_v21 = vadd.f32 %v1871_v35, %v1870_v46  ;;  %v1877_v47 = vsel %vm119_vm0, %v1866_v44, 0.0  ;;  %v1879_v5 = vsel %vm119_vm0, %v1867_v49, 0.0  ;;  %v1881_v57 = vsel %vm119_vm0, %v1868_v53, 0.0 }
 0xa7c   :  { %v1883_v60 = vsel %vm119_vm0, %v1869_v54, 0.0 }
 0xa7d   :  { %v1874_v48 = vadd.f32 %v1873_v45, %v1872_v21 }
 0xa7f   :  { %v1876_v52 = vadd.f32 %v1875_v51, %v1874_v48 }
 0xa81   :  { %v1878_v7 = vadd.f32 %v1877_v47, %v1876_v52 }
 0xa83   :  { %v1880_v56 = vadd.f32 %v1879_v5, %v1878_v7 }
 0xa85   :  { %v1882_v58 = vadd.f32 %v1881_v57, %v1880_v56 }
 0xa87   :  { %v1884_v61 = vadd.f32 %v1883_v60, %v1882_v58 }
 0xa89   :  { %1885 = vadd.xlane.f32.xlu0 %v1884_v61 }
 0xb16   :  { %v1886_v62 = vpop.xlane.xlu0 %1885 }
 0xb17   :  { %v1887_v9 = vrot.slane %v1886_v62, 4 }
 0xb19   :  { %v1888_v8 = vadd.f32 %v1887_v9, %v1886_v62 }
 0xb1b   :  { %v1889_v0 = vrot.slane %v1888_v8, 2 }
 0xb1d   :  { %v1890_v1 = vadd.f32 %v1889_v0, %v1888_v8 }
 0xb1f   :  { %v1891_v2 = vrot.slane %v1890_v1, 1 }
 0xb21   :  { %v1892_v3 = vadd.f32 %v1891_v2, %v1890_v1 }
 0xb23   :  { %2329 = vpush %v1892_v3 }
 0xb54   :  { %s2330_s21 = spop %2329 }
 0xb55   :  { %s1896_s24 = smul.f32 0.00048828125, %s2330_s21 }
 0xb57   :  { %s1897_s3 = sadd.f32 1e-05, %s1896_s24 }
 0xb59   :  { %v1898_v6 = vstv %s1897_s3 }
 0xb5a   :  { %2419 = vrsqrt.f32 %v1898_v6 }
 0xb64   :  { %v2420_v14 = vpop.eup %2419 }
 0xb65   :  { %2331 = vpush %v2420_v14 }
 0xb96   :  { %s2332_s27 = spop %2331 }
 0xb97   :  { %v1901_v15 = vstv %s2332_s27 }
 0xb98   :  { %v1902_v11 = vmul.f32 %v1901_v15, %v1854_v23  ;;  %v1903_v10 = vmul.f32 %v1901_v15, %v1855_v17  ;;  %v1904_v16 = vmul.f32 %v1901_v15, %v1856_v36  ;;  %v1905_v38 = vmul.f32 %v1901_v15, %v1857_v31 }
 0xb99   :  { %v1906_v55 = vmul.f32 %v1901_v15, %v1858_v37  ;;  %v1907_v63 = vmul.f32 %v1901_v15, %v1859_v41  ;;  %v1908_v18 = vmul.f32 %v1901_v15, %v1860_v42  ;;  %v1909_v12 = vmul.f32 %v1901_v15, %v1861_v22 }
 0xb9a   :  { %1910 = vst.msk [vmem:[#allocation11] sm:$0xff] %vm119_vm0, %v1902_v11  ;;  %1911 = vst.msk [vmem:[#allocation11 + $0x8] sm:$0xff] %vm119_vm0, %v1903_v10 }
 0xb9b   :  { %1912 = vst.msk [vmem:[#allocation11 + $0x10] sm:$0xff] %vm119_vm0, %v1904_v16  ;;  %1913 = vst.msk [vmem:[#allocation11 + $0x18] sm:$0xff] %vm119_vm0, %v1905_v38 }
 0xb9c   :  { %1914 = vst.msk [vmem:[#allocation11 + $0x20] sm:$0xff] %vm119_vm0, %v1906_v55  ;;  %1915 = vst.msk [vmem:[#allocation11 + $0x28] sm:$0xff] %vm119_vm0, %v1907_v63 }
 0xb9d   :  { %1916 = vst.msk [vmem:[#allocation11 + $0x30] sm:$0xff] %vm119_vm0, %v1908_v18  ;;  %1917 = vst.msk [vmem:[#allocation11 + $0x38] sm:$0xff] %vm119_vm0, %v1909_v12 }
 0xb9e   :  { %2542 = shalt.err (!%p2539_p2)
}
 0xb9f   :  { %s2543_s12 = scalar_lea.hbm %s3167_s10, 1024 }
 0xba0   :  { %p2544_p3 = scmp.ne.s32.totalorder %s3167_s10, %s2543_s12  ;;  %p2547_p4 = scmp.lt.u32.totalorder %s2543_s12, %s3167_s10 }
 0xba2   :  { %p2549_p5 = pnand %p2547_p4, %p2544_p3 }
 0xba4   :  { %2552 = shalt.err (!%p2549_p5)
}
 0xba5   :  { %1929 = dma.vmem_to_hbm [thread:$0]  %s1924_s28, 1024, %s3167_s10, [#allocation4], %s2563_s25, %s2563_s25, %s2564_s26  }
 0xba6   :  { %2559 = dma.done.wait [#allocation4], 1024  }
 0xba7   :  { %2560 = vsyncadd [#allocation4], 4294966272 }
 0xba8   :  { %1933 = vsyncpa [#allocation3], 1 }
 0xba9   :  { %1934 = vsyncpa [#allocation6], 1 }
 0xbaa   :  { %1935 = vsyncpa [#allocation9], 1 }
 0xbab   :  { %1936 = vsyncpa [#allocation4], 1 }

</bundles_post_ra>
